<compile_context>
chip_gen: v7x
topology: tpu7x:2x2x1
jax: 0.10.0
libtpu: 0.0.40
codegen_flags: <defaults>
</compile_context>

<pallas_src>
import functools

import jax
import jax.numpy as jnp
from jax.experimental import pallas as pl
from jax.experimental.pallas import tpu as pltpu


_LANE = 128


def _round_up(x, m):
    return (x + m - 1) // m * m


def _disc_kernel(x_ref,
                 w1_ref, b1_ref,
                 w2_ref, b2_ref,
                 w3_ref, b3_ref,
                 w4_ref, b4_ref,
                 w5_ref, b5_ref,
                 o_ref):
    def layer(h, w_ref, b_ref, *, act):
        out = jnp.dot(h, w_ref[...], preferred_element_type=jnp.float32)
        out = out + b_ref[...]                              # f32 bias broadcast
        if act:
            out = jnp.where(out >= 0, out, 0.2 * out)       # LeakyReLU(0.2), f32
            return out.astype(jnp.bfloat16)                 # bf16 operand for next dot
        return out

    h = x_ref[...]                                          # [tb, D], already bf16
    h = layer(h, w1_ref, b1_ref, act=True)                  # [tb, 256]
    h = layer(h, w2_ref, b2_ref, act=True)                  # [tb, 128]
    h = layer(h, w3_ref, b3_ref, act=True)                  # [tb, 128] (64 real)
    h = layer(h, w4_ref, b4_ref, act=True)                  # [tb, 128] (64 real)
    logits = layer(h, w5_ref, b5_ref, act=False)            # [tb, 128], cols 1..127 are exact 0

    # Columns 1..127 of w5/b5 are exact zeros, so the lane-reduce equals column 0.
    logit = jnp.sum(logits, axis=-1, keepdims=True)         # [tb, 1], f32

    # Numerically stable sigmoid in f32; exp + reciprocal route to the EUP slot.
    z = jnp.exp(-jnp.abs(logit))
    r = pl.reciprocal(1.0 + z, approx=True)
    o_ref[...] = jnp.where(logit >= 0, r, z * r).astype(o_ref.dtype)


@functools.partial(jax.jit, static_argnames=("block_b",))
def discriminator_forward(x, packed_params, block_b=None):
    """x: [B, image_dim] float32 (or bf16). packed_params: output of pack_params()."""
    B, D = x.shape

    if block_b is None:
        B_128 = _round_up(B, _LANE)
        if B_128 <= 2 * _LANE:
            # Tiny batches: 128-row steps (B <= 128 -> single step; else 2 steps).
            block_b = _LANE
        else:
            # >= 2 grid steps so v7x megacore can shard the parallel batch axis;
            # up to 1024 rows/step to amortize the ~0.35 us per-step overhead.
            block_b = min(1024, _round_up(B_128 // 2, _LANE))

    # Stream x as bf16: the kernel is HBM-bound on this input.
    x = x.astype(jnp.bfloat16)
    B_pad = _round_up(B, block_b)
    if B_pad != B:
        x = jnp.pad(x, ((0, B_pad - B), (0, 0)))

    flat = []
    in_specs = [pl.BlockSpec((block_b, D), lambda i: (i, 0))]
    for w, b in packed_params:
        flat.extend((w, b))
        # Whole parameter resident in VMEM; constant block index -> fetched once.
        in_specs.append(pl.BlockSpec(w.shape, lambda i: (0, 0)))
        in_specs.append(pl.BlockSpec(b.shape, lambda i: (0, 0)))

    out_spec = pl.BlockSpec((block_b, 1), lambda i: (i, 0))

    out = pl.pallas_call(
        _disc_kernel,
        out_shape=jax.ShapeDtypeStruct((B_pad, 1), jnp.float32),
        grid_spec=pltpu.PrefetchScalarGridSpec(
            num_scalar_prefetch=0,
            grid=(B_pad // block_b,),
            in_specs=in_specs,
            out_specs=out_spec,
        ),
        compiler_params=pltpu.CompilerParams(
            dimension_semantics=("parallel",),
            vmem_limit_bytes=32 << 20,
        ),
    )(x, *flat)
    return out[:B]


def init_params(key, image_dim):
    """nn.Linear-style init, logical (unpadded) shapes: W [in,out], b [out]."""
    dims = [image_dim, 256, 128, 64, 64, 1]
    params = []
    for i in range(5):
        fan_in, fan_out = dims[i], dims[i + 1]
        key, kw, kb = jax.random.split(key, 3)
        bound = 1.0 / jnp.sqrt(fan_in)
        w = jax.random.uniform(kw, (fan_in, fan_out), jnp.float32, -bound, bound)
        b = jax.random.uniform(kb, (fan_out,), jnp.float32, -bound, bound)
        params.append((w, b))
    return params


def pack_params(params):
    """Zero-pad all dims < 128 up to 128 and cast weights to bf16 (one-time).

    Input image dim (layer 0 fan_in) is deliberately NOT padded: padding it
    would inflate the dominant HBM input stream of a memory-bound kernel.
    Zero-padding of w5/b5 output columns makes the in-kernel lane-reduce exact.
    """
    packed = []
    for idx, (w, b) in enumerate(params):
        fan_in, fan_out = w.shape
        in_p = fan_in if idx == 0 else _round_up(fan_in, _LANE)
        out_p = _round_up(fan_out, _LANE)
        w_p = jnp.zeros((in_p, out_p), jnp.bfloat16)
        w_p = w_p.at[:fan_in, :fan_out].set(w.astype(jnp.bfloat16))
        b_p = jnp.zeros((1, out_p), jnp.float32)
        b_p = b_p.at[0, :fan_out].set(b)
        packed.append((w_p, b_p))
    return packed


def reference_forward(x, params):
    """Pure-JAX reference mirroring the kernel numerics (bf16 operands, f32 acc)."""
    h = x.astype(jnp.bfloat16).astype(jnp.float32)
    for i, (w, b) in enumerate(params):
        w32 = w.astype(jnp.bfloat16).astype(jnp.float32)
        h = h @ w32 + b[None, :]
        if i < 4:
            h = jnp.where(h >= 0, h, 0.2 * h)
            h = h.astype(jnp.bfloat16).astype(jnp.float32)
    return jax.nn.sigmoid(h)


if __name__ == "__main__":
    image_dim = 784          # flattened 28x28 image
    batch = 200              # not a multiple of the tile -> exercises padding path

    key = jax.random.PRNGKey(0)
    key, kx = jax.random.split(key)
    x = jax.random.normal(kx, (batch, image_dim), jnp.float32)

    params = init_params(key, image_dim)
    packed = pack_params(params)

    out = discriminator_forward(x, packed)
    out = jax.block_until_ready(out)

    ref = reference_forward(x, params)
    assert out.shape == (batch, 1)
    max_err = jnp.max(jnp.abs(out - ref))
    assert jnp.allclose(out, ref, atol=1e-2, rtol=1e-2), f"mismatch vs reference: {max_err}"

    print("KERNEL_OK")
</pallas_src>

<mosaic_0001>
module attributes {stable_mosaic.version = 11 : i64} {
  func.func @_disc_kernel(%arg0: i32, %arg1: memref<128x784xbf16, #tpu.memory_space<vmem>>, %arg2: memref<784x256xbf16, #tpu.memory_space<vmem>>, %arg3: memref<1x256xf32, #tpu.memory_space<vmem>>, %arg4: memref<256x128xbf16, #tpu.memory_space<vmem>>, %arg5: memref<1x128xf32, #tpu.memory_space<vmem>>, %arg6: memref<128x128xbf16, #tpu.memory_space<vmem>>, %arg7: memref<1x128xf32, #tpu.memory_space<vmem>>, %arg8: memref<128x128xbf16, #tpu.memory_space<vmem>>, %arg9: memref<1x128xf32, #tpu.memory_space<vmem>>, %arg10: memref<128x128xbf16, #tpu.memory_space<vmem>>, %arg11: memref<1x128xf32, #tpu.memory_space<vmem>>, %arg12: memref<128x1xf32, #tpu.memory_space<vmem>>) attributes {dimension_semantics = [#tpu.dimension_semantics<parallel>], iteration_bounds = array<i64: 2>, scalar_prefetch = 0 : i64, scratch_operands = 0 : i64, tpu.core_type = #tpu.core_type<tc>, window_params = [{transform_indices = @transform_0, window_bounds = array<i64: 128, 784>}, {pipeline_mode = #tpu.pipeline_mode<synchronous>, transform_indices = @transform_1, window_bounds = array<i64: 784, 256>}, {pipeline_mode = #tpu.pipeline_mode<synchronous>, transform_indices = @transform_2, window_bounds = array<i64: 1, 256>}, {pipeline_mode = #tpu.pipeline_mode<synchronous>, transform_indices = @transform_3, window_bounds = array<i64: 256, 128>}, {pipeline_mode = #tpu.pipeline_mode<synchronous>, transform_indices = @transform_4, window_bounds = array<i64: 1, 128>}, {pipeline_mode = #tpu.pipeline_mode<synchronous>, transform_indices = @transform_5, window_bounds = array<i64: 128, 128>}, {pipeline_mode = #tpu.pipeline_mode<synchronous>, transform_indices = @transform_6, window_bounds = array<i64: 1, 128>}, {pipeline_mode = #tpu.pipeline_mode<synchronous>, transform_indices = @transform_7, window_bounds = array<i64: 128, 128>}, {pipeline_mode = #tpu.pipeline_mode<synchronous>, transform_indices = @transform_8, window_bounds = array<i64: 1, 128>}, {pipeline_mode = #tpu.pipeline_mode<synchronous>, transform_indices = @transform_9, window_bounds = array<i64: 128, 128>}, {pipeline_mode = #tpu.pipeline_mode<synchronous>, transform_indices = @transform_10, window_bounds = array<i64: 1, 128>}, {transform_indices = @transform_11, window_bounds = array<i64: 128, 1>}]} {
    %c0 = arith.constant 0 : index
    %c0_0 = arith.constant 0 : index
    %0 = vector.load %arg1[%c0, %c0_0] : memref<128x784xbf16, #tpu.memory_space<vmem>>, vector<128x784xbf16>
    %c0_1 = arith.constant 0 : index
    %c0_2 = arith.constant 0 : index
    %1 = vector.load %arg2[%c0_1, %c0_2] : memref<784x256xbf16, #tpu.memory_space<vmem>>, vector<784x256xbf16>
    %cst = arith.constant dense<0.000000e+00> : vector<128x256xf32>
    %2 = tpu.matmul %0, %1, %cst {dimension_numbers = #tpu.dot_dimension_numbers<[1], [0], [0], [1], [0, 0, 1, 1], [], []>} : vector<128x784xbf16>, vector<784x256xbf16>, vector<128x256xf32> -> vector<128x256xf32>
    %c0_3 = arith.constant 0 : index
    %c0_4 = arith.constant 0 : index
    %3 = vector.load %arg3[%c0_3, %c0_4] : memref<1x256xf32, #tpu.memory_space<vmem>>, vector<1x256xf32>
    %4 = vector.broadcast %3 : vector<1x256xf32> to vector<128x256xf32>
    %5 = arith.addf %2, %4 : vector<128x256xf32>
    %cst_5 = arith.constant 0.000000e+00 : f32
    %6 = vector.broadcast %cst_5 : f32 to vector<128x256xf32>
    %7 = arith.cmpf oge, %5, %6 : vector<128x256xf32>
    %cst_6 = arith.constant 2.000000e-01 : f32
    %8 = vector.broadcast %cst_6 : f32 to vector<128x256xf32>
    %9 = arith.mulf %8, %5 : vector<128x256xf32>
    %10 = arith.select %7, %5, %9 : vector<128x256xi1>, vector<128x256xf32>
    %11 = arith.truncf %10 : vector<128x256xf32> to vector<128x256xbf16>
    %c0_7 = arith.constant 0 : index
    %c0_8 = arith.constant 0 : index
    %12 = vector.load %arg4[%c0_7, %c0_8] : memref<256x128xbf16, #tpu.memory_space<vmem>>, vector<256x128xbf16>
    %cst_9 = arith.constant dense<0.000000e+00> : vector<128x128xf32>
    %13 = tpu.matmul %11, %12, %cst_9 {dimension_numbers = #tpu.dot_dimension_numbers<[1], [0], [0], [1], [0, 0, 1, 1], [], []>} : vector<128x256xbf16>, vector<256x128xbf16>, vector<128x128xf32> -> vector<128x128xf32>
    %c0_10 = arith.constant 0 : index
    %c0_11 = arith.constant 0 : index
    %14 = vector.load %arg5[%c0_10, %c0_11] : memref<1x128xf32, #tpu.memory_space<vmem>>, vector<1x128xf32>
    %15 = vector.broadcast %14 : vector<1x128xf32> to vector<128x128xf32>
    %16 = arith.addf %13, %15 : vector<128x128xf32>
    %cst_12 = arith.constant 0.000000e+00 : f32
    %17 = vector.broadcast %cst_12 : f32 to vector<128x128xf32>
    %18 = arith.cmpf oge, %16, %17 : vector<128x128xf32>
    %cst_13 = arith.constant 2.000000e-01 : f32
    %19 = vector.broadcast %cst_13 : f32 to vector<128x128xf32>
    %20 = arith.mulf %19, %16 : vector<128x128xf32>
    %21 = arith.select %18, %16, %20 : vector<128x128xi1>, vector<128x128xf32>
    %22 = arith.truncf %21 : vector<128x128xf32> to vector<128x128xbf16>
    %c0_14 = arith.constant 0 : index
    %c0_15 = arith.constant 0 : index
    %23 = vector.load %arg6[%c0_14, %c0_15] : memref<128x128xbf16, #tpu.memory_space<vmem>>, vector<128x128xbf16>
    %cst_16 = arith.constant dense<0.000000e+00> : vector<128x128xf32>
    %24 = tpu.matmul %22, %23, %cst_16 {dimension_numbers = #tpu.dot_dimension_numbers<[1], [0], [0], [1], [0, 0, 1, 1], [], []>} : vector<128x128xbf16>, vector<128x128xbf16>, vector<128x128xf32> -> vector<128x128xf32>
    %c0_17 = arith.constant 0 : index
    %c0_18 = arith.constant 0 : index
    %25 = vector.load %arg7[%c0_17, %c0_18] : memref<1x128xf32, #tpu.memory_space<vmem>>, vector<1x128xf32>
    %26 = vector.broadcast %25 : vector<1x128xf32> to vector<128x128xf32>
    %27 = arith.addf %24, %26 : vector<128x128xf32>
    %cst_19 = arith.constant 0.000000e+00 : f32
    %28 = vector.broadcast %cst_19 : f32 to vector<128x128xf32>
    %29 = arith.cmpf oge, %27, %28 : vector<128x128xf32>
    %cst_20 = arith.constant 2.000000e-01 : f32
    %30 = vector.broadcast %cst_20 : f32 to vector<128x128xf32>
    %31 = arith.mulf %30, %27 : vector<128x128xf32>
    %32 = arith.select %29, %27, %31 : vector<128x128xi1>, vector<128x128xf32>
    %33 = arith.truncf %32 : vector<128x128xf32> to vector<128x128xbf16>
    %c0_21 = arith.constant 0 : index
    %c0_22 = arith.constant 0 : index
    %34 = vector.load %arg8[%c0_21, %c0_22] : memref<128x128xbf16, #tpu.memory_space<vmem>>, vector<128x128xbf16>
    %cst_23 = arith.constant dense<0.000000e+00> : vector<128x128xf32>
    %35 = tpu.matmul %33, %34, %cst_23 {dimension_numbers = #tpu.dot_dimension_numbers<[1], [0], [0], [1], [0, 0, 1, 1], [], []>} : vector<128x128xbf16>, vector<128x128xbf16>, vector<128x128xf32> -> vector<128x128xf32>
    %c0_24 = arith.constant 0 : index
    %c0_25 = arith.constant 0 : index
    %36 = vector.load %arg9[%c0_24, %c0_25] : memref<1x128xf32, #tpu.memory_space<vmem>>, vector<1x128xf32>
    %37 = vector.broadcast %36 : vector<1x128xf32> to vector<128x128xf32>
    %38 = arith.addf %35, %37 : vector<128x128xf32>
    %cst_26 = arith.constant 0.000000e+00 : f32
    %39 = vector.broadcast %cst_26 : f32 to vector<128x128xf32>
    %40 = arith.cmpf oge, %38, %39 : vector<128x128xf32>
    %cst_27 = arith.constant 2.000000e-01 : f32
    %41 = vector.broadcast %cst_27 : f32 to vector<128x128xf32>
    %42 = arith.mulf %41, %38 : vector<128x128xf32>
    %43 = arith.select %40, %38, %42 : vector<128x128xi1>, vector<128x128xf32>
    %44 = arith.truncf %43 : vector<128x128xf32> to vector<128x128xbf16>
    %c0_28 = arith.constant 0 : index
    %c0_29 = arith.constant 0 : index
    %45 = vector.load %arg10[%c0_28, %c0_29] : memref<128x128xbf16, #tpu.memory_space<vmem>>, vector<128x128xbf16>
    %cst_30 = arith.constant dense<0.000000e+00> : vector<128x128xf32>
    %46 = tpu.matmul %44, %45, %cst_30 {dimension_numbers = #tpu.dot_dimension_numbers<[1], [0], [0], [1], [0, 0, 1, 1], [], []>} : vector<128x128xbf16>, vector<128x128xbf16>, vector<128x128xf32> -> vector<128x128xf32>
    %c0_31 = arith.constant 0 : index
    %c0_32 = arith.constant 0 : index
    %47 = vector.load %arg11[%c0_31, %c0_32] : memref<1x128xf32, #tpu.memory_space<vmem>>, vector<1x128xf32>
    %48 = vector.broadcast %47 : vector<1x128xf32> to vector<128x128xf32>
    %49 = arith.addf %46, %48 : vector<128x128xf32>
    %cst_33 = arith.constant dense<0.000000e+00> : vector<128xf32>
    %50 = vector.multi_reduction <add>, %49, %cst_33 [1] : vector<128x128xf32> to vector<128xf32>
    %51 = vector.shape_cast %50 : vector<128xf32> to vector<128x1xf32>
    %52 = math.absf %51 : vector<128x1xf32>
    %cst_34 = arith.constant 0.000000e+00 : f32
    %53 = vector.broadcast %cst_34 : f32 to vector<128x1xf32>
    %54 = arith.subf %53, %52 : vector<128x1xf32>
    %55 = math.exp %54 : vector<128x1xf32>
    %cst_35 = arith.constant 1.000000e+00 : f32
    %56 = vector.broadcast %cst_35 : f32 to vector<128x1xf32>
    %57 = arith.addf %56, %55 : vector<128x1xf32>
    %58 = tpu.reciprocal %57 {approx = true} : vector<128x1xf32> -> vector<128x1xf32>
    %cst_36 = arith.constant 0.000000e+00 : f32
    %59 = vector.broadcast %cst_36 : f32 to vector<128x1xf32>
    %60 = arith.cmpf oge, %51, %59 : vector<128x1xf32>
    %61 = arith.mulf %55, %58 : vector<128x1xf32>
    %62 = arith.select %60, %58, %61 : vector<128x1xi1>, vector<128x1xf32>
    %c0_37 = arith.constant 0 : index
    %c0_38 = arith.constant 0 : index
    %63 = vector.load %arg12[%c0_37, %c0_38] : memref<128x1xf32, #tpu.memory_space<vmem>>, vector<128x1xf32>
    tpu.vector_store %arg12[%c0_37, %c0_38], %62 {strides = array<i32>} : memref<128x1xf32, #tpu.memory_space<vmem>>, vector<128x1xf32>,
    return
  }
  func.func @transform_0(%arg0: i32) -> (i32, i32) {
    %c0_i32 = arith.constant 0 : i32
    %c0_i32_0 = arith.constant 0 : i32
    return %arg0, %c0_i32 : i32, i32
  }
  func.func @transform_1(%arg0: i32) -> (i32, i32) {
    %c0_i32 = arith.constant 0 : i32
    %c0_i32_0 = arith.constant 0 : i32
    %c0_i32_1 = arith.constant 0 : i32
    return %c0_i32, %c0_i32_0 : i32, i32
  }
  func.func @transform_2(%arg0: i32) -> (i32, i32) {
    %c0_i32 = arith.constant 0 : i32
    %c0_i32_0 = arith.constant 0 : i32
    %c0_i32_1 = arith.constant 0 : i32
    return %c0_i32, %c0_i32_0 : i32, i32
  }
  func.func @transform_3(%arg0: i32) -> (i32, i32) {
    %c0_i32 = arith.constant 0 : i32
    %c0_i32_0 = arith.constant 0 : i32
    %c0_i32_1 = arith.constant 0 : i32
    return %c0_i32, %c0_i32_0 : i32, i32
  }
  func.func @transform_4(%arg0: i32) -> (i32, i32) {
    %c0_i32 = arith.constant 0 : i32
    %c0_i32_0 = arith.constant 0 : i32
    %c0_i32_1 = arith.constant 0 : i32
    return %c0_i32, %c0_i32_0 : i32, i32
  }
  func.func @transform_5(%arg0: i32) -> (i32, i32) {
    %c0_i32 = arith.constant 0 : i32
    %c0_i32_0 = arith.constant 0 : i32
    %c0_i32_1 = arith.constant 0 : i32
    return %c0_i32, %c0_i32_0 : i32, i32
  }
  func.func @transform_6(%arg0: i32) -> (i32, i32) {
    %c0_i32 = arith.constant 0 : i32
    %c0_i32_0 = arith.constant 0 : i32
    %c0_i32_1 = arith.constant 0 : i32
    return %c0_i32, %c0_i32_0 : i32, i32
  }
  func.func @transform_7(%arg0: i32) -> (i32, i32) {
    %c0_i32 = arith.constant 0 : i32
    %c0_i32_0 = arith.constant 0 : i32
    %c0_i32_1 = arith.constant 0 : i32
    return %c0_i32, %c0_i32_0 : i32, i32
  }
  func.func @transform_8(%arg0: i32) -> (i32, i32) {
    %c0_i32 = arith.constant 0 : i32
    %c0_i32_0 = arith.constant 0 : i32
    %c0_i32_1 = arith.constant 0 : i32
    return %c0_i32, %c0_i32_0 : i32, i32
  }
  func.func @transform_9(%arg0: i32) -> (i32, i32) {
    %c0_i32 = arith.constant 0 : i32
    %c0_i32_0 = arith.constant 0 : i32
    %c0_i32_1 = arith.constant 0 : i32
    return %c0_i32, %c0_i32_0 : i32, i32
  }
  func.func @transform_10(%arg0: i32) -> (i32, i32) {
    %c0_i32 = arith.constant 0 : i32
    %c0_i32_0 = arith.constant 0 : i32
    %c0_i32_1 = arith.constant 0 : i32
    return %c0_i32, %c0_i32_0 : i32, i32
  }
  func.func @transform_11(%arg0: i32) -> (i32, i32) {
    %c0_i32 = arith.constant 0 : i32
    %c0_i32_0 = arith.constant 0 : i32
    return %arg0, %c0_i32 : i32, i32
  }
}

</mosaic_0001>

<bundles_post_ra>
// kernel: discriminator_forward.1
= control target key start
LH: loop header
LB: loop body
LE: loop exit
PB: predicated region body
PF: predicated region fallthrough
CT: control target
= control target key end

     0   :  { %s4043_s17 = smov 0   ;;  %s4843_s0 = inlined_call_operand.vmem [shape: bf16[256,784], index: 0, kind: input, shape index: {}]   ;;  %s4844_s1 = inlined_call_operand.vmem [shape: bf16[784,256], index: 1, kind: input, shape index: {}]   ;;  %s4845_s2 = inlined_call_operand.vmem [shape: f32[1,256], index: 2, kind: input, shape index: {}]   ;;  %s4846_s3 = inlined_call_operand.vmem [shape: bf16[256,128], index: 3, kind: input, shape index: {}]   ;;  %s4847_s4 = inlined_call_operand.vmem [shape: f32[1,128], index: 4, kind: input, shape index: {}]   ;;  %s4848_s5 = inlined_call_operand.vmem [shape: bf16[128,128], index: 5, kind: input, shape index: {}]   ;;  %s4849_s6 = inlined_call_operand.vmem [shape: f32[1,128], index: 6, kind: input, shape index: {}]   ;;  %s4850_s7 = inlined_call_operand.vmem [shape: bf16[128,128], index: 7, kind: input, shape index: {}]   ;;  %s4851_s8 = inlined_call_operand.vmem [shape: f32[1,128], index: 8, kind: input, shape index: {}]   ;;  %s4852_s9 = inlined_call_operand.vmem [shape: bf16[128,128], index: 9, kind: input, shape index: {}]   ;;  %s4853_s10 = inlined_call_operand.vmem [shape: f32[1,128], index: 10, kind: input, shape index: {}]   ;;  %s4854_s11 = inlined_call_operand.vmem [shape: f32[256,1], index: 11, kind: output, shape index: {}]  }
   0x1 LB: > { %s3080_s18 = sadd.s32 4294967295, %s3980_s17   ;;  %p3084_p0 = scmp.ge.s32.totalorder %s3980_s17, 1  ;;  %s3980_s17 = sphi %s4043_s17, %s21_s17  }
   0x2   : > { %p339_p1 = scmp.lt.s32.totalorder %s3980_s17, 3 }
   0x4   : > { %p340_p2 = pnand %p3084_p0, %p339_p1 }
   0x5   : > { %v3643_v0 = vld [vmem:[%s4844_s1 + $0x4] ss:$8 sps:$4 sm:$0xff] (!%p340_p2)   ;;  %v3645_v1 = vld [vmem:[%s4844_s1] ss:$8 sps:$4 sm:$0xff] (!%p340_p2)   ;;  %v3646_v2 = vld [vmem:[%s4844_s1 + $0x14] ss:$8 sps:$4 sm:$0xff] (!%p340_p2)  }
   0x6   : > { %343 = sbr.rel (%p340_p2) target bundleno = 1547 (0x60b), region = 64  ;;  %1363 = vmatprep.subr.bf16.mxu0 (!%p340_p2), %v3643_v0  ;;  %v3648_v3 = vld [vmem:[%s4844_s1 + $0x10] ss:$8 sps:$4 sm:$0xff] (!%p340_p2)   ;;  %v3649_v4 = vld [vmem:[%s4844_s1 + $0x24] ss:$8 sps:$4 sm:$0xff] (!%p340_p2)   ;;  %s3085_s29 = sshll.u32 (!%p340_p2), %s3080_s18, 4 }
   0x7   : > { %1364 = vmatpush1.bf16.msra.mxu0 (!%p340_p2), %v3645_v1  ;;  %v3651_v5 = vld [vmem:[%s4844_s1 + $0x20] ss:$8 sps:$4 sm:$0xff] (!%p340_p2)   ;;  %p381_p3 = scmp.lt.s32.totalorder (!%p340_p2), %s3085_s29, 31  ;;  %v3652_v6 = vld [vmem:[%s4844_s1 + $0x34] ss:$8 sps:$4 sm:$0xff] (!%p340_p2)   ;;  %v3982_v38 = vmov (!%p340_p2), 0  }
   0x8   : > { %1365 = vmatprep.subr.bf16.mxu0 (!%p340_p2), %v3646_v2  ;;  %v3654_v7 = vld [vmem:[%s4844_s1 + $0x30] ss:$8 sps:$4 sm:$0xff] (!%p340_p2)   ;;  %v3655_v8 = vld [vmem:[%s4844_s1 + $0x44] ss:$8 sps:$4 sm:$0xff] (!%p340_p2)   ;;  %v3657_v9 = vld [vmem:[%s4844_s1 + $0x40] ss:$8 sps:$4 sm:$0xff] (!%p340_p2)   ;;  %1734 = vmatprep.mubr.bf16.mxu1 (!%p340_p2), %v3982_v38 }
   0x9   : > { %v3658_v10 = vld [vmem:[%s4844_s1 + $0x54] ss:$8 sps:$4 sm:$0xff] (!%p340_p2)   ;;  %v3660_v11 = vld [vmem:[%s4844_s1 + $0x50] ss:$8 sps:$4 sm:$0xff] (!%p340_p2)   ;;  %v3661_v12 = vld [vmem:[%s4844_s1 + $0x64] ss:$8 sps:$4 sm:$0xff] (!%p340_p2)  }
   0xa   : > { %v3663_v14 = vld [vmem:[%s4844_s1 + $0x60] ss:$8 sps:$4 sm:$0xff] (!%p340_p2)   ;;  %v3664_v15 = vld [vmem:[%s4844_s1 + $0x74] ss:$8 sps:$4 sm:$0xff] (!%p340_p2)   ;;  %v3666_v16 = vld [vmem:[%s4844_s1 + $0x70] ss:$8 sps:$4 sm:$0xff] (!%p340_p2)  }
   0xb   : > { %1366 = vmatpush1.bf16.msra.mxu0 (!%p340_p2), %v3648_v3  ;;  %v3667_v17 = vld [vmem:[%s4844_s1 + $0x84] ss:$8 sps:$4 sm:$0xff] (!%p340_p2)   ;;  %v3669_v18 = vld [vmem:[%s4844_s1 + $0x80] ss:$8 sps:$4 sm:$0xff] (!%p340_p2)   ;;  %v3670_v19 = vld [vmem:[%s4844_s1 + $0x94] ss:$8 sps:$4 sm:$0xff] (!%p340_p2)  }
   0xc   : > { %1367 = vmatprep.subr.bf16.mxu0 (!%p340_p2), %v3649_v4  ;;  %v3672_v20 = vld [vmem:[%s4844_s1 + $0x90] ss:$8 sps:$4 sm:$0xff] (!%p340_p2)   ;;  %v3673_v21 = vld [vmem:[%s4844_s1 + $0xa4] ss:$8 sps:$4 sm:$0xff] (!%p340_p2)   ;;  %v3675_v22 = vld [vmem:[%s4844_s1 + $0xa0] ss:$8 sps:$4 sm:$0xff] (!%p340_p2)  }
   0xd   : > { %s4856_s29 = smov (!%p381_p3, %s3085_s29), 31  ;;  %v3676_v23 = vld [vmem:[%s4844_s1 + $0xb4] ss:$8 sps:$4 sm:$0xff]   ;;  %v3678_v24 = vld [vmem:[%s4844_s1 + $0xb0] ss:$8 sps:$4 sm:$0xff]   ;;  %vm1338_vm0 = vcmask 130048  }
   0xe   : > { %s3633_s22 = smul.u32 28, %s4856_s29  ;;  %v3679_v25 = vld [vmem:[%s4844_s1 + $0xc4] ss:$8 sps:$4 sm:$0xff]   ;;  %v3681_v26 = vld [vmem:[%s4844_s1 + $0xc0] ss:$8 sps:$4 sm:$0xff]   ;;  %s3088_s14 = sshll.u32 %s4856_s29, 3 }
   0xf   : > { %1368 = vmatpush1.bf16.msra.mxu0 %v3651_v5  ;;  %v3682_v27 = vld [vmem:[%s4844_s1 + $0xd4] ss:$8 sps:$4 sm:$0xff]   ;;  %v3684_v28 = vld [vmem:[%s4844_s1 + $0xd0] ss:$8 sps:$4 sm:$0xff]   ;;  %v3685_v29 = vld [vmem:[%s4844_s1 + $0xe4] ss:$8 sps:$4 sm:$0xff]   ;;  %s4766_s18 = scalar_lea.vmem %s4854_s11, %s3088_s14 }
  0x10   : > { %1369 = vmatprep.subr.bf16.mxu0 %v3652_v6  ;;  %s4093_s30 = scalar_lea.vmem %s4843_s0, %s3633_s22  ;;  %v3687_v30 = vld [vmem:[%s4844_s1 + $0xe0] ss:$8 sps:$4 sm:$0xff]   ;;  %v3688_v31 = vld [vmem:[%s4844_s1 + $0xf4] ss:$8 sps:$4 sm:$0xff]   ;;  %v3690_v32 = vld [vmem:[%s4844_s1 + $0xf0] ss:$8 sps:$4 sm:$0xff]  }
  0x11   : > { %v3693_v13 = vld [vmem:[%s4093_s30 + $0x4] ss:$28 sps:$4 sm:$0xff]   ;;  %v3700_v36 = vld [vmem:[%s4093_s30 + $0x3c] ss:$28 sps:$4 sm:$0xff]   ;;  %v3709_v43 = vld [vmem:[%s4093_s30 + $0x74] ss:$28 sps:$4 sm:$0xff]  }
  0x12   : > { %1395 = vmatprep.mubr.bf16.mxu0 %v3693_v13  ;;  %v3696_v33 = vld [vmem:[%s4844_s1 + $0x104] ss:$8 sps:$4 sm:$0xff]   ;;  %v3691_v34 = vld [vmem:[%s4093_s30] ss:$28 sps:$4 sm:$0xff]   ;;  %v3697_v39 = vld [vmem:[%s4844_s1 + $0x110] ss:$8 sps:$4 sm:$0xff]  }
  0x13   : > { %1370 = vmatpush1.bf16.msra.mxu0 %v3654_v7  ;;  %v3694_v35 = vld [vmem:[%s4844_s1 + $0x100] ss:$8 sps:$4 sm:$0xff]   ;;  %v3699_v37 = vld [vmem:[%s4844_s1 + $0x114] ss:$8 sps:$4 sm:$0xff]   ;;  %v3705_v40 = vld [vmem:[%s4844_s1 + $0x124] ss:$8 sps:$4 sm:$0xff]  }
  0x14   : > { %1371 = vmatprep.subr.bf16.mxu0 %v3655_v8  ;;  %v3702_v41 = vld [vmem:[%s4093_s30 + $0x38] ss:$28 sps:$4 sm:$0xff]   ;;  %v3703_v42 = vld [vmem:[%s4844_s1 + $0x120] ss:$8 sps:$4 sm:$0xff]   ;;  %v3714_v46 = vld [vmem:[%s4844_s1 + $0x144] ss:$8 sps:$4 sm:$0xff]  }
  0x15   : > { %v3708_v44 = vld [vmem:[%s4844_s1 + $0x134] ss:$8 sps:$4 sm:$0xff]   ;;  %v3706_v45 = vld [vmem:[%s4844_s1 + $0x130] ss:$8 sps:$4 sm:$0xff]   ;;  %v3712_v48 = vld [vmem:[%s4844_s1 + $0x140] ss:$8 sps:$4 sm:$0xff]  }
  0x16   : > { %v3711_v47 = vld [vmem:[%s4093_s30 + $0x70] ss:$28 sps:$4 sm:$0xff]   ;;  %v3717_v50 = vld [vmem:[%s4844_s1 + $0x154] ss:$8 sps:$4 sm:$0xff]   ;;  %v3720_v52 = vld [vmem:[%s4093_s30 + $0xa8] ss:$28 sps:$4 sm:$0xff]  }
  0x17   : > { %1372 = vmatpush1.bf16.msra.mxu0 %v3657_v9  ;;  %v3718_v49 = vld [vmem:[%s4093_s30 + $0xac] ss:$28 sps:$4 sm:$0xff]   ;;  %v3715_v51 = vld [vmem:[%s4844_s1 + $0x150] ss:$8 sps:$4 sm:$0xff]   ;;  %v3726_v57 = vld [vmem:[%s4844_s1 + $0x174] ss:$8 sps:$4 sm:$0xff]  }
  0x18   : > { %1373 = vmatprep.subr.bf16.mxu0 %v3658_v10  ;;  %v3723_v53 = vld [vmem:[%s4844_s1 + $0x164] ss:$8 sps:$4 sm:$0xff]   ;;  %v3721_v54 = vld [vmem:[%s4844_s1 + $0x160] ss:$8 sps:$4 sm:$0xff]   ;;  %v3841_v59 = vld [vmem:[%s4093_s30 + $0x18] ss:$28 sps:$4 sm:$0xff]  }
  0x19   : > { %v3835_v55 = vld [vmem:[%s4844_s1 + $0x304] ss:$8 sps:$4 sm:$0xff]   ;;  %v3837_v56 = vld [vmem:[%s4844_s1 + $0x300] ss:$8 sps:$4 sm:$0xff]   ;;  %v3724_v60 = vld [vmem:[%s4844_s1 + $0x170] ss:$8 sps:$4 sm:$0xff]  }
  0x1a   : > { %v3727_v58 = vld [vmem:[%s4093_s30 + $0xe4] ss:$28 sps:$4 sm:$0xff]   ;;  %1702 = vmatprep.subr.bf16.mxu1 %v3835_v55  ;;  %v3735_v0 = vld [vmem:[%s4844_s1 + $0x194] ss:$8 sps:$4 sm:$0xff]   ;;  %v3845_v2 = vld [vmem:[%s4093_s30 + $0x50] ss:$28 sps:$4 sm:$0xff]  }
  0x1b   : > { %1374 = vmatpush1.bf16.msra.mxu0 %v3660_v11  ;;  %1703 = vmatpush1.bf16.msra.mxu1 %v3837_v56  ;;  %v3732_v61 = vld [vmem:[%s4844_s1 + $0x184] ss:$8 sps:$4 sm:$0xff]   ;;  %v3729_v62 = vld [vmem:[%s4093_s30 + $0xe0] ss:$28 sps:$4 sm:$0xff]   ;;  %v3733_v3 = vld [vmem:[%s4844_s1 + $0x190] ss:$8 sps:$4 sm:$0xff]  }
  0x1c   : > { %1375 = vmatprep.subr.bf16.mxu0 %v3661_v12  ;;  %v3730_v63 = vld [vmem:[%s4844_s1 + $0x180] ss:$8 sps:$4 sm:$0xff]   ;;  %v3736_v1 = vld [vmem:[%s4093_s30 + $0x11c] ss:$28 sps:$4 sm:$0xff]   ;;  %v3741_v4 = vld [vmem:[%s4844_s1 + $0x1a4] ss:$8 sps:$4 sm:$0xff]  }
  0x1d   : > { %v3738_v5 = vld [vmem:[%s4093_s30 + $0x118] ss:$28 sps:$4 sm:$0xff]   ;;  %v3739_v6 = vld [vmem:[%s4844_s1 + $0x1a0] ss:$8 sps:$4 sm:$0xff]   ;;  %v3750_v11 = vld [vmem:[%s4844_s1 + $0x1c4] ss:$8 sps:$4 sm:$0xff]  }
  0x1e   : > { %3243 = vmatmul.mubr.msk.bf16.vlgmr.msra.gmra.mrb[0].mxu1 %vm1338_vm0, %v3841_v59  ;;  %v3745_v7 = vld [vmem:[%s4093_s30 + $0x154] ss:$28 sps:$4 sm:$0xff]   ;;  %v3849_v9 = vld [vmem:[%s4093_s30 + $0x88] ss:$28 sps:$4 sm:$0xff]   ;;  %v3869_v56 = vld [vmem:[%s4093_s30 + $0x1a0] ss:$28 sps:$4 sm:$0xff]  }
  0x1f   : > { %1376 = vmatpush1.bf16.msra.mxu0 %v3663_v14  ;;  %1744 = vmatprep.mubr.bf16.mxu1 %v3982_v38  ;;  %v3744_v8 = vld [vmem:[%s4844_s1 + $0x1b4] ss:$8 sps:$4 sm:$0xff]   ;;  %v3742_v10 = vld [vmem:[%s4844_s1 + $0x1b0] ss:$8 sps:$4 sm:$0xff]   ;;  %v3748_v13 = vld [vmem:[%s4844_s1 + $0x1c0] ss:$8 sps:$4 sm:$0xff]  }
  0x20   : > { %1377 = vmatprep.subr.bf16.mxu0 %v3664_v15  ;;  %v3747_v12 = vld [vmem:[%s4093_s30 + $0x150] ss:$28 sps:$4 sm:$0xff]   ;;  %v3753_v15 = vld [vmem:[%s4844_s1 + $0x1d4] ss:$8 sps:$4 sm:$0xff]  }
  0x21   : > { %v3754_v14 = vld [vmem:[%s4093_s30 + $0x18c] ss:$28 sps:$4 sm:$0xff]   ;;  %v3790_v55 = vld [vmem:[%s4093_s30 + $0xb4] ss:$28 sps:$4 sm:$0xff]  }
  0x22   : > { %v3787_v59 = vld [vmem:[%s4844_s1 + $0x250] ss:$8 sps:$4 sm:$0xff]  }
  0x23   : > { %1378 = vmatpush1.bf16.msra.mxu0 %v3666_v16  ;;  %v3853_v16 = vld [vmem:[%s4093_s30 + $0xc0] ss:$28 sps:$4 sm:$0xff]  }
  0x24   : > { %1379 = vmatprep.subr.bf16.mxu0 %v3667_v17  ;;  %v3751_v17 = vld [vmem:[%s4844_s1 + $0x1d0] ss:$8 sps:$4 sm:$0xff]  }
  0x26   : > { %3244 = vmatmul.mubr.msk.bf16.gmra.mrb[4].mxu1 %vm1338_vm0, %v3845_v2  ;;  %v3804_v2 = vld [vmem:[%s4844_s1 + $0x284] ss:$8 sps:$4 sm:$0xff]  }
  0x27   : > { %1380 = vmatpush1.bf16.msra.mxu0 %v3669_v18  ;;  %1754 = vmatprep.mubr.bf16.mxu1 %v3982_v38  ;;  %v3759_v18 = vld [vmem:[%s4844_s1 + $0x1e4] ss:$8 sps:$4 sm:$0xff]  }
  0x28   : > { %1381 = vmatprep.subr.bf16.mxu0 %v3670_v19  ;;  %v3756_v19 = vld [vmem:[%s4093_s30 + $0x188] ss:$28 sps:$4 sm:$0xff]  }
  0x2b   : > { %1382 = vmatpush1.bf16.msra.mxu0 %v3672_v20  ;;  %v3757_v20 = vld [vmem:[%s4844_s1 + $0x1e0] ss:$8 sps:$4 sm:$0xff]  }
  0x2c   : > { %1383 = vmatprep.subr.bf16.mxu0 %v3673_v21  ;;  %v3765_v21 = vld [vmem:[%s4093_s30 + $0xc] ss:$28 sps:$4 sm:$0xff]  }
  0x2e   : > { %3245 = vmatmul.mubr.msk.bf16.gmra.mrb[8].mxu1 %vm1338_vm0, %v3849_v9  ;;  %v3810_v9 = vld [vmem:[%s4093_s30 + $0x120] ss:$28 sps:$4 sm:$0xff]  }
  0x2f   : > { %1384 = vmatpush1.bf16.msra.mxu0 %v3675_v22  ;;  %1764 = vmatprep.mubr.bf16.mxu1 %v3982_v38  ;;  %v3762_v22 = vld [vmem:[%s4844_s1 + $0x1f4] ss:$8 sps:$4 sm:$0xff]  }
  0x30   : > { %1385 = vmatprep.subr.bf16.mxu0 %v3676_v23  ;;  %v3857_v23 = vld [vmem:[%s4093_s30 + $0xf8] ss:$28 sps:$4 sm:$0xff]  }
  0x33   : > { %1386 = vmatpush1.bf16.msra.mxu0 %v3678_v24  ;;  %v3870_v24 = vld [vmem:[%s4846_s3 + $0x40] sm:$0xff]  }
  0x34   : > { %1387 = vmatprep.subr.bf16.mxu0 %v3679_v25  ;;  %v3871_v25 = vld [vmem:[%s4846_s3] sm:$0xff]   ;;  %3297 = vmatprep.subr.bf16.mxu1 %v3870_v24  ;;  %v3834_v24 = vld [vmem:[%s4844_s1 + $0x2f4] ss:$8 sps:$4 sm:$0xff]  }
  0x35   : > { %3298 = vmatpush3.bf16.msra.mxu1 %v3871_v25  ;;  %v3832_v25 = vld [vmem:[%s4844_s1 + $0x2f0] ss:$8 sps:$4 sm:$0xff]  }
  0x36   : > { %3246 = vmatmul.mubr.msk.bf16.gmra.mrb[12].mxu1 %vm1338_vm0, %v3853_v16  ;;  %v3820_v16 = vld [vmem:[%s4844_s1 + $0x2c0] ss:$8 sps:$4 sm:$0xff]  }
  0x37   : > { %1388 = vmatpush1.bf16.msra.mxu0 %v3681_v26  ;;  %1774 = vmatprep.mubr.bf16.mxu1 %v3982_v38  ;;  %v3760_v26 = vld [vmem:[%s4844_s1 + $0x1f0] ss:$8 sps:$4 sm:$0xff]  }
  0x38   : > { %1389 = vmatprep.subr.bf16.mxu0 %v3682_v27  ;;  %v3872_v27 = vld [vmem:[%s4846_s3 + $0x48] sm:$0xff]  }
  0x39   : > { %3299 = vmatprep.subr.bf16.mxu1 %v3872_v27  ;;  %v3842_v27 = vld [vmem:[%s4093_s30 + $0x4c] ss:$28 sps:$4 sm:$0xff]  }
  0x3b   : > { %1390 = vmatpush1.bf16.msra.mxu0 %v3684_v28  ;;  %v3768_v28 = vld [vmem:[%s4844_s1 + $0x204] ss:$8 sps:$4 sm:$0xff]  }
  0x3c   : > { %1391 = vmatprep.subr.bf16.mxu0 %v3685_v29  ;;  %v3763_v29 = vld [vmem:[%s4093_s30 + $0x8] ss:$28 sps:$4 sm:$0xff]  }
  0x3e   : > { %3247 = vmatmul.mubr.msk.bf16.gmra.mrb[16].mxu1 %vm1338_vm0, %v3857_v23  ;;  %v3840_v23 = vld [vmem:[%s4093_s30 + $0x14] ss:$28 sps:$4 sm:$0xff]  }
  0x3f   : > { %1392 = vmatpush1.bf16.msra.mxu0 %v3687_v30  ;;  %v3766_v30 = vld [vmem:[%s4844_s1 + $0x200] ss:$8 sps:$4 sm:$0xff]   ;;  %1784 = vmatprep.mubr.bf16.mxu1 %v3982_v38 }
  0x40   : > { %1393 = vmatprep.subr.bf16.mxu0 %v3688_v31  ;;  %v3771_v31 = vld [vmem:[%s4844_s1 + $0x214] ss:$8 sps:$4 sm:$0xff]  }
  0x43   : > { %1394 = vmatpush1.bf16.msra.mxu0 %v3690_v32  ;;  %v3772_v32 = vld [vmem:[%s4093_s30 + $0x44] ss:$28 sps:$4 sm:$0xff]  }
  0x44   : > { %1476 = vmatprep.subr.bf16.mxu0 %v3696_v33  ;;  %v3861_v33 = vld [vmem:[%s4093_s30 + $0x130] ss:$28 sps:$4 sm:$0xff]  }
  0x46   : > { %1396 = vmatmul.mubr.bf16.vlgmr.msra.gmra.mrb[0].mxu0 %v3691_v34  ;;  %v3873_v34 = vld [vmem:[%s4846_s3 + $0x8] sm:$0xff]   ;;  %3248 = vmatmul.mubr.msk.bf16.gmra.mrb[20].mxu1 %vm1338_vm0, %v3861_v33  ;;  %v3854_v33 = vld [vmem:[%s4093_s30 + $0xf4] ss:$28 sps:$4 sm:$0xff]  }
  0x47   : > { %1477 = vmatpush1.bf16.msra.mxu0 %v3694_v35  ;;  %1405 = vmatprep.mubr.bf16.mxu0 %v3700_v36  ;;  %v3874_v35 = vld [vmem:[%s4846_s3 + $0x50] sm:$0xff]  }
  0x48   : > { %1478 = vmatprep.subr.bf16.mxu0 %v3699_v37  ;;  %v3875_v36 = vld [vmem:[%s4846_s3 + $0x10] sm:$0xff]   ;;  %3300 = vmatpush3.bf16.msra.mxu1 %v3873_v34 }
  0x49   : > { %v3769_v37 = vld [vmem:[%s4844_s1 + $0x210] ss:$8 sps:$4 sm:$0xff]   ;;  %1794 = vmatprep.mubr.bf16.mxu1 %v3982_v38  ;;  %3301 = vmatprep.subr.bf16.mxu1 %v3874_v35  ;;  %v3858_v35 = vld [vmem:[%s4093_s30 + $0x12c] ss:$28 sps:$4 sm:$0xff]  }
  0x4a   : > { %v3856_v34 = vld [vmem:[%s4093_s30 + $0xf0] ss:$28 sps:$4 sm:$0xff]  }
  0x4b   : > { %1479 = vmatpush1.bf16.msra.mxu0 %v3697_v39  ;;  %v3876_v39 = vld [vmem:[%s4846_s3 + $0x58] sm:$0xff]  }
  0x4c   : > { %1480 = vmatprep.subr.bf16.mxu0 %v3705_v40  ;;  %v3777_v40 = vld [vmem:[%s4844_s1 + $0x224] ss:$8 sps:$4 sm:$0xff]   ;;  %3302 = vmatpush3.bf16.msra.mxu1 %v3875_v36 }
  0x4d   : > { %3303 = vmatprep.subr.bf16.mxu1 %v3876_v39  ;;  %v3860_v36 = vld [vmem:[%s4093_s30 + $0x128] ss:$28 sps:$4 sm:$0xff]   ;;  %v3864_v39 = vld [vmem:[%s4093_s30 + $0x160] ss:$28 sps:$4 sm:$0xff]  }
  0x4e   : > { %1406 = vmatmul.mubr.bf16.gmra.mrb[4].mxu0 %v3702_v41  ;;  %v3774_v41 = vld [vmem:[%s4093_s30 + $0x40] ss:$28 sps:$4 sm:$0xff]  }
  0x4f   : > { %1481 = vmatpush1.bf16.msra.mxu0 %v3703_v42  ;;  %1415 = vmatprep.mubr.bf16.mxu0 %v3709_v43  ;;  %v3877_v42 = vld [vmem:[%s4846_s3 + $0x18] sm:$0xff]   ;;  %v3775_v43 = vld [vmem:[%s4844_s1 + $0x220] ss:$8 sps:$4 sm:$0xff]  }
  0x50   : > { %1482 = vmatprep.subr.bf16.mxu0 %v3708_v44  ;;  %v3781_v44 = vld [vmem:[%s4093_s30 + $0x7c] ss:$28 sps:$4 sm:$0xff]   ;;  %3304 = vmatpush3.bf16.msra.mxu1 %v3877_v42 }
  0x51   : > { %v3884_v42 = vld [vmem:[%s4846_s3 + $0x78] sm:$0xff]  }
  0x53   : > { %1483 = vmatpush1.bf16.msra.mxu0 %v3706_v45  ;;  %v3780_v45 = vld [vmem:[%s4844_s1 + $0x234] ss:$8 sps:$4 sm:$0xff]  }
  0x54   : > { %1484 = vmatprep.subr.bf16.mxu0 %v3714_v46  ;;  %v3865_v46 = vld [vmem:[%s4093_s30 + $0x168] ss:$28 sps:$4 sm:$0xff]  }
  0x55   : > { %3249 = vmatmul.mubr.msk.bf16.gmra.mrb[24].mxu1 %vm1338_vm0, %v3865_v46 }
  0x56   : > { %1416 = vmatmul.mubr.bf16.gmra.mrb[8].mxu0 %v3711_v47  ;;  %v3878_v47 = vld [vmem:[%s4846_s3 + $0x60] sm:$0xff]   ;;  %1804 = vmatprep.mubr.bf16.mxu1 %v3982_v38  ;;  %v3789_v38 = vld [vmem:[%s4844_s1 + $0x254] ss:$8 sps:$4 sm:$0xff]  }
  0x57   : > { %1485 = vmatpush1.bf16.msra.mxu0 %v3712_v48  ;;  %1425 = vmatprep.mubr.bf16.mxu0 %v3718_v49  ;;  %v3879_v48 = vld [vmem:[%s4846_s3 + $0x20] sm:$0xff]   ;;  %v3778_v49 = vld [vmem:[%s4844_s1 + $0x230] ss:$8 sps:$4 sm:$0xff]  }
  0x58   : > { %1486 = vmatprep.subr.bf16.mxu0 %v3717_v50  ;;  %v3880_v50 = vld [vmem:[%s4846_s3 + $0x68] sm:$0xff]   ;;  %3305 = vmatprep.subr.bf16.mxu1 %v3878_v47 }
  0x59   : > { %3306 = vmatpush3.bf16.msra.mxu1 %v3879_v48 }
  0x5a   : > { %3307 = vmatprep.subr.bf16.mxu1 %v3880_v50 }
  0x5b   : > { %1487 = vmatpush1.bf16.msra.mxu0 %v3715_v51  ;;  %v3786_v51 = vld [vmem:[%s4844_s1 + $0x244] ss:$8 sps:$4 sm:$0xff]  }
  0x5c   : > { %1488 = vmatprep.subr.bf16.mxu0 %v3723_v53  ;;  %v3881_v53 = vld [vmem:[%s4846_s3 + $0x28] sm:$0xff]  }
  0x5d   : > { %3308 = vmatpush3.bf16.msra.mxu1 %v3881_v53 }
  0x5e   : > { %1426 = vmatmul.mubr.bf16.gmra.mrb[12].mxu0 %v3720_v52  ;;  %v3783_v52 = vld [vmem:[%s4093_s30 + $0x78] ss:$28 sps:$4 sm:$0xff]   ;;  %3250 = vmatmul.mubr.msk.bf16.gmra.mrb[28].mxu1 %vm1338_vm0, %v3869_v56 }
  0x5f   : > { %1489 = vmatpush1.bf16.msra.mxu0 %v3721_v54  ;;  %1435 = vmatprep.mubr.bf16.mxu0 %v3727_v58  ;;  %v3784_v54 = vld [vmem:[%s4844_s1 + $0x240] ss:$8 sps:$4 sm:$0xff]   ;;  %v3883_v58 = vld [vmem:[%s4846_s3 + $0x30] sm:$0xff]  }
  0x60   : > { %1490 = vmatprep.subr.bf16.mxu0 %v3726_v57  ;;  %v3882_v57 = vld [vmem:[%s4846_s3 + $0x70] sm:$0xff]  }
  0x61   : > { %3309 = vmatprep.subr.bf16.mxu1 %v3882_v57 }
  0x62   : > { %3310 = vmatpush3.bf16.msra.mxu1 %v3883_v58 }
  0x63   : > { %1491 = vmatpush1.bf16.msra.mxu0 %v3724_v60  ;;  %v3795_v60 = vld [vmem:[%s4844_s1 + $0x264] ss:$8 sps:$4 sm:$0xff]   ;;  %3311 = vmatprep.subr.bf16.mxu1 %v3884_v42 }
  0x64   : > { %1492 = vmatprep.subr.bf16.mxu0 %v3732_v61  ;;  %v3792_v61 = vld [vmem:[%s4093_s30 + $0xb0] ss:$28 sps:$4 sm:$0xff]  }
  0x66   : > { %1436 = vmatmul.mubr.bf16.gmra.mrb[16].mxu0 %v3729_v62  ;;  %v3793_v62 = vld [vmem:[%s4844_s1 + $0x260] ss:$8 sps:$4 sm:$0xff]  }
  0x67   : > { %1493 = vmatpush1.bf16.msra.mxu0 %v3730_v63  ;;  %1445 = vmatprep.mubr.bf16.mxu0 %v3736_v1  ;;  %v3799_v63 = vld [vmem:[%s4093_s30 + $0xec] ss:$28 sps:$4 sm:$0xff]   ;;  %v3796_v1 = vld [vmem:[%s4844_s1 + $0x270] ss:$8 sps:$4 sm:$0xff]  }
  0x68   : > { %1494 = vmatprep.subr.bf16.mxu0 %v3735_v0  ;;  %v3798_v0 = vld [vmem:[%s4844_s1 + $0x274] ss:$8 sps:$4 sm:$0xff]  }
  0x6b   : > { %1495 = vmatpush1.bf16.msra.mxu0 %v3733_v3  ;;  %v3801_v3 = vld [vmem:[%s4093_s30 + $0xe8] ss:$28 sps:$4 sm:$0xff]  }
  0x6c   : > { %1496 = vmatprep.subr.bf16.mxu0 %v3741_v4  ;;  %v3802_v4 = vld [vmem:[%s4844_s1 + $0x280] ss:$8 sps:$4 sm:$0xff]  }
  0x6e   : > { %1446 = vmatmul.mubr.bf16.gmra.mrb[20].mxu0 %v3738_v5  ;;  %v3808_v5 = vld [vmem:[%s4093_s30 + $0x124] ss:$28 sps:$4 sm:$0xff]  }
  0x6f   : > { %1497 = vmatpush1.bf16.msra.mxu0 %v3739_v6  ;;  %1455 = vmatprep.mubr.bf16.mxu0 %v3745_v7  ;;  %v3807_v6 = vld [vmem:[%s4844_s1 + $0x294] ss:$8 sps:$4 sm:$0xff]   ;;  %v3805_v7 = vld [vmem:[%s4844_s1 + $0x290] ss:$8 sps:$4 sm:$0xff]  }
  0x70   : > { %1498 = vmatprep.subr.bf16.mxu0 %v3744_v8  ;;  %v3813_v8 = vld [vmem:[%s4844_s1 + $0x2a4] ss:$8 sps:$4 sm:$0xff]  }
  0x73   : > { %1499 = vmatpush1.bf16.msra.mxu0 %v3742_v10  ;;  %v3811_v10 = vld [vmem:[%s4844_s1 + $0x2a0] ss:$8 sps:$4 sm:$0xff]  }
  0x74   : > { %1500 = vmatprep.subr.bf16.mxu0 %v3750_v11  ;;  %v3817_v11 = vld [vmem:[%s4093_s30 + $0x15c] ss:$28 sps:$4 sm:$0xff]  }
  0x76   : > { %1456 = vmatmul.mubr.bf16.gmra.mrb[24].mxu0 %v3747_v12  ;;  %v3816_v12 = vld [vmem:[%s4844_s1 + $0x2b4] ss:$8 sps:$4 sm:$0xff]  }
  0x77   : > { %1501 = vmatpush1.bf16.msra.mxu0 %v3748_v13  ;;  %1465 = vmatprep.mubr.bf16.mxu0 %v3754_v14  ;;  %v3814_v13 = vld [vmem:[%s4844_s1 + $0x2b0] ss:$8 sps:$4 sm:$0xff]   ;;  %v3822_v14 = vld [vmem:[%s4844_s1 + $0x2c4] ss:$8 sps:$4 sm:$0xff]  }
  0x78   : > { %1502 = vmatprep.subr.bf16.mxu0 %v3753_v15  ;;  %v3819_v15 = vld [vmem:[%s4093_s30 + $0x158] ss:$28 sps:$4 sm:$0xff]  }
  0x7b   : > { %1503 = vmatpush1.bf16.msra.mxu0 %v3751_v17  ;;  %v3826_v17 = vld [vmem:[%s4093_s30 + $0x194] ss:$28 sps:$4 sm:$0xff]  }
  0x7c   : > { %1504 = vmatprep.subr.bf16.mxu0 %v3759_v18  ;;  %v3825_v18 = vld [vmem:[%s4844_s1 + $0x2d4] ss:$8 sps:$4 sm:$0xff]  }
  0x7e   : > { %1466 = vmatmul.mubr.bf16.gmra.mrb[28].mxu0 %v3756_v19  ;;  %v3823_v19 = vld [vmem:[%s4844_s1 + $0x2d0] ss:$8 sps:$4 sm:$0xff]  }
  0x7f   : > { %1505 = vmatpush1.bf16.msra.mxu0 %v3757_v20  ;;  %1508 = vmatprep.mubr.bf16.mxu0 %v3765_v21  ;;  %v3831_v20 = vld [vmem:[%s4844_s1 + $0x2e4] ss:$8 sps:$4 sm:$0xff]  }
  0x80   : > { %1506 = vmatprep.subr.bf16.mxu0 %v3762_v22  ;;  %v3828_v21 = vld [vmem:[%s4093_s30 + $0x190] ss:$28 sps:$4 sm:$0xff]   ;;  %v3829_v22 = vld [vmem:[%s4844_s1 + $0x2e0] ss:$8 sps:$4 sm:$0xff]  }
  0x83   : > { %1507 = vmatpush1.bf16.msra.mxu0 %v3760_v26  ;;  %v3838_v26 = vld [vmem:[%s4093_s30 + $0x10] ss:$28 sps:$4 sm:$0xff]  }
  0x84   : > { %1589 = vmatprep.subr.bf16.mxu0 %v3768_v28  ;;  %v3844_v28 = vld [vmem:[%s4093_s30 + $0x48] ss:$28 sps:$4 sm:$0xff]  }
  0x86   : > { %1509 = vmatmul.mubr.bf16.vlgmr.msra.gmra.mrb[0].mxu0 %v3763_v29  ;;  %v3846_v29 = vld [vmem:[%s4093_s30 + $0x84] ss:$28 sps:$4 sm:$0xff]  }
  0x87   : > { %1590 = vmatpush1.bf16.msra.mxu0 %v3766_v30  ;;  %1518 = vmatprep.mubr.bf16.mxu0 %v3772_v32  ;;  %v3848_v30 = vld [vmem:[%s4093_s30 + $0x80] ss:$28 sps:$4 sm:$0xff]   ;;  %v3852_v32 = vld [vmem:[%s4093_s30 + $0xb8] ss:$28 sps:$4 sm:$0xff]  }
  0x88   : > { %1591 = vmatprep.subr.bf16.mxu0 %v3771_v31  ;;  %v3850_v31 = vld [vmem:[%s4093_s30 + $0xbc] ss:$28 sps:$4 sm:$0xff]  }
  0x8b   : > { %1592 = vmatpush1.bf16.msra.mxu0 %v3769_v37  ;;  %v3862_v37 = vld [vmem:[%s4093_s30 + $0x164] ss:$28 sps:$4 sm:$0xff]  }
  0x8c   : > { %1593 = vmatprep.subr.bf16.mxu0 %v3777_v40  ;;  %v3866_v40 = vld [vmem:[%s4093_s30 + $0x19c] ss:$28 sps:$4 sm:$0xff]  }
  0x8e   : > { %1519 = vmatmul.mubr.bf16.gmra.mrb[4].mxu0 %v3774_v41  ;;  %v3868_v41 = vld [vmem:[%s4093_s30 + $0x198] ss:$28 sps:$4 sm:$0xff]  }
  0x8f   : > { %1594 = vmatpush1.bf16.msra.mxu0 %v3775_v43  ;;  %1528 = vmatprep.mubr.bf16.mxu0 %v3781_v44  ;;  %v3885_v43 = vld [vmem:[%s4846_s3 + $0x38] sm:$0xff]  }
  0x90   : > { %1595 = vmatprep.subr.bf16.mxu0 %v3780_v45  ;;  %3312 = vmatpush3.bf16.msra.mxu1 %v3885_v43 }
  0x93   : > { %1596 = vmatpush1.bf16.msra.mxu0 %v3778_v49 }
  0x94   : > { %1597 = vmatprep.subr.bf16.mxu0 %v3786_v51 }
  0x96   : > { %1529 = vmatmul.mubr.bf16.gmra.mrb[8].mxu0 %v3783_v52 }
  0x97   : > { %1598 = vmatpush1.bf16.msra.mxu0 %v3784_v54  ;;  %1538 = vmatprep.mubr.bf16.mxu0 %v3790_v55 }
  0x98   : > { %1599 = vmatprep.subr.bf16.mxu0 %v3789_v38 }
  0x9b   : > { %1600 = vmatpush1.bf16.msra.mxu0 %v3787_v59 }
  0x9c   : > { %1601 = vmatprep.subr.bf16.mxu0 %v3795_v60 }
  0x9e   : > { %1539 = vmatmul.mubr.bf16.gmra.mrb[12].mxu0 %v3792_v61 }
  0x9f   : > { %1602 = vmatpush1.bf16.msra.mxu0 %v3793_v62  ;;  %1548 = vmatprep.mubr.bf16.mxu0 %v3799_v63 }
  0xa0   : > { %1603 = vmatprep.subr.bf16.mxu0 %v3798_v0 }
  0xa3   : > { %1604 = vmatpush1.bf16.msra.mxu0 %v3796_v1 }
  0xa4   : > { %1605 = vmatprep.subr.bf16.mxu0 %v3804_v2 }
  0xa6   : > { %1549 = vmatmul.mubr.bf16.gmra.mrb[16].mxu0 %v3801_v3  ;;  %v4516_v3 = vld [vmem:[%s4848_s5] sm:$0xff]  }
  0xa7   : > { %1606 = vmatpush1.bf16.msra.mxu0 %v3802_v4  ;;  %1558 = vmatprep.mubr.bf16.mxu0 %v3808_v5 }
  0xa8   : > { %1607 = vmatprep.subr.bf16.mxu0 %v3807_v6  ;;  %3409 = vmatprep.subr.bf16.mxu1 %v4516_v3 }
  0xab   : > { %1608 = vmatpush1.bf16.msra.mxu0 %v3805_v7 }
  0xac   : > { %1609 = vmatprep.subr.bf16.mxu0 %v3813_v8 }
  0xae   : > { %1559 = vmatmul.mubr.bf16.gmra.mrb[20].mxu0 %v3810_v9 }
  0xaf   : > { %1610 = vmatpush1.bf16.msra.mxu0 %v3811_v10  ;;  %1568 = vmatprep.mubr.bf16.mxu0 %v3817_v11 }
  0xb0   : > { %1611 = vmatprep.subr.bf16.mxu0 %v3816_v12  ;;  %v558_v12 = vlaneseq }
  0xb3   : > { %1612 = vmatpush1.bf16.msra.mxu0 %v3814_v13  ;;  %v559_v13 = vshrl.u32 %v558_v12, 7 }
  0xb4   : > { %1613 = vmatprep.subr.bf16.mxu0 %v3822_v14 }
  0xb5   : > { %v560_v14 = vsub.s32 0, %v559_v13 }
  0xb6   : > { %1569 = vmatmul.mubr.bf16.gmra.mrb[24].mxu0 %v3819_v15  ;;  %v556_v15 = vld [vmem:[%s4845_s2] sm:$0x3] }
  0xb7   : > { %1614 = vmatpush1.bf16.msra.mxu0 %v3820_v16  ;;  %1578 = vmatprep.mubr.bf16.mxu0 %v3826_v17  ;;  %v564_v16 = vsub.s32 1, %v559_v13  ;;  %v4538_v17 = vrot.slane %v556_v15, %v560_v14 }
  0xb8   : > { %1615 = vmatprep.subr.bf16.mxu0 %v3825_v18 }
  0xb9   : > { %v4540_v18 = vrot.slane %v556_v15, %v564_v16  ;;  %v3887_v16 = vld [vmem:[%s4848_s5 + $0x8] sm:$0xff]  }
  0xbb   : > { %1616 = vmatpush1.bf16.msra.mxu0 %v3823_v19 }
  0xbc   : > { %1617 = vmatprep.subr.bf16.mxu0 %v3831_v20 }
  0xbe   : > { %1579 = vmatmul.mubr.bf16.gmra.mrb[28].mxu0 %v3828_v21 }
  0xbf   : > { %1618 = vmatpush1.bf16.msra.mxu0 %v3829_v22  ;;  %1621 = vmatprep.mubr.bf16.mxu0 %v3840_v23 }
  0xc0   : > { %1619 = vmatprep.subr.bf16.mxu0 %v3834_v24 }
  0xc3   : > { %1620 = vmatpush1.bf16.msra.mxu0 %v3832_v25 }
  0xc6   : > { %1622 = vmatmul.mubr.bf16.vlgmr.msra.gmra.mrb[0].mxu0 %v3838_v26 }
  0xc7   : > { %1631 = vmatprep.mubr.bf16.mxu0 %v3842_v27 }
  0xce   : > { %1632 = vmatmul.mubr.bf16.gmra.mrb[4].mxu0 %v3844_v28 }
  0xcf   : > { %1641 = vmatprep.mubr.bf16.mxu0 %v3846_v29 }
  0xd6   : > { %1642 = vmatmul.mubr.bf16.gmra.mrb[8].mxu0 %v3848_v30 }
  0xd7   : > { %1651 = vmatprep.mubr.bf16.mxu0 %v3850_v31 }
  0xde   : > { %1652 = vmatmul.mubr.bf16.gmra.mrb[12].mxu0 %v3852_v32 }
  0xdf   : > { %1661 = vmatprep.mubr.bf16.mxu0 %v3854_v33 }
  0xe6   : > { %1662 = vmatmul.mubr.bf16.gmra.mrb[16].mxu0 %v3856_v34 }
  0xe7   : > { %1671 = vmatprep.mubr.bf16.mxu0 %v3858_v35 }
  0xee   : > { %1672 = vmatmul.mubr.bf16.gmra.mrb[20].mxu0 %v3860_v36 }
  0xef   : > { %1681 = vmatprep.mubr.bf16.mxu0 %v3862_v37 }
  0xf1   : > { %v1736_v44 = vpop.f32.mrb[0].mxu1 }
  0xf2   : > { %v1738_v45 = vpop.f32.mrb[1].mxu1 }
  0xf3   : > { %v1740_v46 = vpop.f32.mrb[2].mxu1 }
  0xf4   : > { %v1742_v47 = vpop.f32.mrb[3].mxu1 }
  0xf6   : > { %1682 = vmatmul.mubr.bf16.gmra.mrb[24].mxu0 %v3864_v39 }
  0xf7   : > { %1691 = vmatprep.mubr.bf16.mxu0 %v3866_v40 }
  0xf9   : > { %v4473_v48 = vpop.f32.mrb[4].mxu1 }
  0xfa   : > { %v4475_v49 = vpop.f32.mrb[5].mxu1 }
  0xfb   : > { %v4477_v50 = vpop.f32.mrb[6].mxu1 }
  0xfc   : > { %v4479_v51 = vpop.f32.mrb[7].mxu1 }
  0xfe   : > { %1692 = vmatmul.mubr.bf16.gmra.mrb[28].mxu0 %v3868_v41 }
 0x101   : > { %v4481_v52 = vpop.f32.mrb[8].mxu1 }
 0x102   : > { %v4483_v53 = vpop.f32.mrb[9].mxu1 }
 0x103   : > { %v4485_v54 = vpop.f32.mrb[10].mxu1 }
 0x104   : > { %v4487_v55 = vpop.f32.mrb[11].mxu1 }
 0x109   : > { %v4489_v38 = vpop.f32.mrb[12].mxu1 }
 0x10a   : > { %v4491_v56 = vpop.f32.mrb[13].mxu1 }
 0x10b   : > { %v4493_v57 = vpop.f32.mrb[14].mxu1 }
 0x10c   : > { %v4495_v58 = vpop.f32.mrb[15].mxu1 }
 0x111   : > { %v4497_v59 = vpop.f32.mrb[16].mxu1 }
 0x112   : > { %v4499_v60 = vpop.f32.mrb[17].mxu1 }
 0x113   : > { %v4501_v61 = vpop.f32.mrb[18].mxu1 }
 0x114   : > { %v4503_v62 = vpop.f32.mrb[19].mxu1 }
 0x119   : > { %v4505_v63 = vpop.f32.mrb[20].mxu1 }
 0x11a   : > { %v4507_v0 = vpop.f32.mrb[21].mxu1 }
 0x11b   : > { %v4509_v1 = vpop.f32.mrb[22].mxu1 }
 0x11c   : > { %v4511_v2 = vpop.f32.mrb[23].mxu1 }
 0x128   : > { %v4519_v4 = vpop.f32.mrb[24].mxu1 }
 0x129   : > { %v4521_v5 = vpop.f32.mrb[25].mxu1 }
 0x12a   : > { %v4523_v6 = vpop.f32.mrb[26].mxu1 }
 0x12b   : > { %v4525_v7 = vpop.f32.mrb[27].mxu1 }
 0x131   : > { %v4527_v8 = vpop.f32.mrb[28].mxu1 }
 0x132   : > { %v4529_v9 = vpop.f32.mrb[29].mxu1 }
 0x133   : > { %v4531_v10 = vpop.f32.mrb[30].mxu1 }
 0x134   : > { %v4533_v11 = vpop.f32.mrb[31].mxu1 }
 0x199   : > { %v1623_v19 = vpop.f32.mrb[0].mxu0 }
 0x19a   : > { %v3505_v20 = vadd.f32 %v1623_v19, %v4538_v17  ;;  %v1625_v21 = vpop.f32.mrb[1].mxu0 }
 0x19b   : > { %v3507_v22 = vadd.f32 %v1625_v21, %v4540_v18  ;;  %v1627_v23 = vpop.f32.mrb[2].mxu0 }
 0x19c   : > { %v3506_v24 = vadd.f32 %v3505_v20, %v1736_v44  ;;  %v3509_v25 = vadd.f32 %v1627_v23, %v4538_v17  ;;  %v1629_v26 = vpop.f32.mrb[3].mxu0 }
 0x19d   : > { %v3508_v27 = vadd.f32 %v3507_v22, %v1738_v45  ;;  %v3511_v28 = vadd.f32 %v1629_v26, %v4540_v18 }
 0x19e   : > { %v1847_v29 = vmul.f32 0.2, %v3506_v24  ;;  %v3510_v30 = vadd.f32 %v3509_v25, %v1740_v46  ;;  %vm1815_vm1 = vcmp.ge.f32.partialorder %v3506_v24, 0.0 }
 0x19f   : > { %v1848_v31 = vmul.f32 0.2, %v3508_v27  ;;  %v3512_v32 = vadd.f32 %v3511_v28, %v1742_v47  ;;  %vm1816_vm2 = vcmp.ge.f32.partialorder %v3508_v27, 0.0 }
 0x1a0   : > { %vm1817_vm3 = vcmp.ge.f32.partialorder %v3510_v30, 0.0  ;;  %v1849_v33 = vmul.f32 0.2, %v3510_v30  ;;  %v1879_v36 = vsel %vm1815_vm1, %v3506_v24, %v1847_v29  ;;  %v3888_v24 = vld [vmem:[%s4848_s5 + $0x10] sm:$0xff]  }
 0x1a1   : > { %vm1818_vm4 = vcmp.ge.f32.partialorder %v3512_v32, 0.0  ;;  %v1850_v34 = vmul.f32 0.2, %v3512_v32  ;;  %v1633_v35 = vpop.f32.mrb[4].mxu0  ;;  %v1880_v44 = vsel %vm1816_vm2, %v3508_v27, %v1848_v31 }
 0x1a2   : > { %v1881_v37 = vsel %vm1817_vm3, %v3510_v30, %v1849_v33  ;;  %v3513_v39 = vadd.f32 %v1633_v35, %v4538_v17  ;;  %v1635_v40 = vpop.f32.mrb[5].mxu0 }
 0x1a3   : > { %v1911_v41 = vpack.c.bf16 %v1881_v37, %v1879_v36  ;;  %v3515_v42 = vadd.f32 %v1635_v40, %v4540_v18  ;;  %v1637_v43 = vpop.f32.mrb[6].mxu0  ;;  %v1882_v45 = vsel %vm1818_vm4, %v3512_v32, %v1850_v34 }
 0x1a4   : > { %v3514_v46 = vadd.f32 %v3513_v39, %v4473_v48  ;;  %v3517_v47 = vadd.f32 %v1637_v43, %v4538_v17  ;;  %v1639_v12 = vpop.f32.mrb[7].mxu0  ;;  %v1912_v13 = vpack.c.bf16 %v1882_v45, %v1880_v44 }
 0x1a5   : > { %v3516_v14 = vadd.f32 %v3515_v42, %v4475_v49  ;;  %v3519_v15 = vadd.f32 %v1639_v12, %v4540_v18 }
 0x1a6   : > { %v1851_v19 = vmul.f32 0.2, %v3514_v46  ;;  %v3518_v20 = vadd.f32 %v3517_v47, %v4477_v50  ;;  %2094 = vmatprep.mubr.bf16.mxu1 %v1912_v13  ;;  %vm1819_vm5 = vcmp.ge.f32.partialorder %v3514_v46, 0.0 }
 0x1a7   : > { %v1852_v21 = vmul.f32 0.2, %v3516_v14  ;;  %v3520_v48 = vadd.f32 %v3519_v15, %v4479_v51  ;;  %2095 = vmatmul.mubr.bf16.vlgmr.msra.gmra.mrb[32].mxu1 %v1911_v41  ;;  %vm1820_vm6 = vcmp.ge.f32.partialorder %v3516_v14, 0.0 }
 0x1a8   : > { %vm1821_vm7 = vcmp.ge.f32.partialorder %v3518_v20, 0.0  ;;  %v1853_v22 = vmul.f32 0.2, %v3518_v20  ;;  %3410 = vmatpush3.bf16.msra.mxu1 %v4516_v3  ;;  %v1883_v26 = vsel %vm1819_vm5, %v3514_v46, %v1851_v19 }
 0x1a9   : > { %vm1822_vm8 = vcmp.ge.f32.partialorder %v3520_v48, 0.0  ;;  %v1854_v49 = vmul.f32 0.2, %v3520_v48  ;;  %v1643_v23 = vpop.f32.mrb[8].mxu0  ;;  %3411 = vmatprep.subr.bf16.mxu1 %v3887_v16  ;;  %v1884_v29 = vsel %vm1820_vm6, %v3516_v14, %v1852_v21 }
 0x1aa   : > { %v3521_v50 = vadd.f32 %v1643_v23, %v4538_v17  ;;  %v1645_v25 = vpop.f32.mrb[9].mxu0  ;;  %v1885_v27 = vsel %vm1821_vm7, %v3518_v20, %v1853_v22 }
 0x1ab   : > { %v3523_v51 = vadd.f32 %v1645_v25, %v4540_v18  ;;  %v1647_v28 = vpop.f32.mrb[10].mxu0  ;;  %v1886_v30 = vsel %vm1822_vm8, %v3520_v48, %v1854_v49  ;;  %v1913_v31 = vpack.c.bf16 %v1885_v27, %v1883_v26 }
 0x1ac   : > { %v3522_v3 = vadd.f32 %v3521_v50, %v4481_v52  ;;  %v3525_v32 = vadd.f32 %v1647_v28, %v4538_v17  ;;  %v1649_v33 = vpop.f32.mrb[11].mxu0  ;;  %v1914_v34 = vpack.c.bf16 %v1886_v30, %v1884_v29  ;;  %3412 = vmatpush3.bf16.msra.mxu1 %v3887_v16 }
 0x1ad   : > { %v3524_v35 = vadd.f32 %v3523_v51, %v4483_v53  ;;  %v3527_v36 = vadd.f32 %v1649_v33, %v4540_v18  ;;  %3413 = vmatprep.subr.bf16.mxu1 %v3888_v24 }
 0x1ae   : > { %v1855_v37 = vmul.f32 0.2, %v3522_v3  ;;  %v3526_v39 = vadd.f32 %v3525_v32, %v4485_v54  ;;  %2102 = vmatprep.mubr.bf16.mxu1 %v1914_v34  ;;  %vm1823_vm9 = vcmp.ge.f32.partialorder %v3522_v3, 0.0 }
 0x1af   : > { %v1856_v40 = vmul.f32 0.2, %v3524_v35  ;;  %v3528_v41 = vadd.f32 %v3527_v36, %v4487_v55  ;;  %2103 = vmatmul.mubr.bf16.gmra.mrb[36].mxu1 %v1913_v31  ;;  %vm1824_vm10 = vcmp.ge.f32.partialorder %v3524_v35, 0.0 }
 0x1b0   : > { %vm1825_vm11 = vcmp.ge.f32.partialorder %v3526_v39, 0.0  ;;  %v1857_v52 = vmul.f32 0.2, %v3526_v39  ;;  %3414 = vmatpush3.bf16.msra.mxu1 %v3888_v24  ;;  %v1887_v45 = vsel %vm1823_vm9, %v3522_v3, %v1855_v37 }
 0x1b1   : > { %vm1826_vm12 = vcmp.ge.f32.partialorder %v3528_v41, 0.0  ;;  %v1858_v42 = vmul.f32 0.2, %v3528_v41  ;;  %v1653_v43 = vpop.f32.mrb[12].mxu0  ;;  %v1888_v12 = vsel %vm1824_vm10, %v3524_v35, %v1856_v40 }
 0x1b2   : > { %v3529_v53 = vadd.f32 %v1653_v43, %v4538_v17  ;;  %v1655_v44 = vpop.f32.mrb[13].mxu0  ;;  %v1889_v46 = vsel %vm1825_vm11, %v3526_v39, %v1857_v52 }
 0x1b3   : > { %v3531_v54 = vadd.f32 %v1655_v44, %v4540_v18  ;;  %v1657_v47 = vpop.f32.mrb[14].mxu0  ;;  %v1890_v13 = vsel %vm1826_vm12, %v3528_v41, %v1858_v42  ;;  %v1915_v14 = vpack.c.bf16 %v1889_v46, %v1887_v45 }
 0x1b4   : > { %v3530_v55 = vadd.f32 %v3529_v53, %v4489_v38  ;;  %v3533_v15 = vadd.f32 %v1657_v47, %v4538_v17  ;;  %v1659_v16 = vpop.f32.mrb[15].mxu0  ;;  %v1916_v19 = vpack.c.bf16 %v1890_v13, %v1888_v12 }
 0x1b5   : > { %v3532_v20 = vadd.f32 %v3531_v54, %v4491_v56  ;;  %v3535_v21 = vadd.f32 %v1659_v16, %v4540_v18 }
 0x1b6   : > { %v1859_v48 = vmul.f32 0.2, %v3530_v55  ;;  %v3534_v22 = vadd.f32 %v3533_v15, %v4493_v57  ;;  %2110 = vmatprep.mubr.bf16.mxu1 %v1916_v19  ;;  %vm1827_vm13 = vcmp.ge.f32.partialorder %v3530_v55, 0.0 }
 0x1b7   : > { %v1860_v49 = vmul.f32 0.2, %v3532_v20  ;;  %v3536_v23 = vadd.f32 %v3535_v21, %v4495_v58  ;;  %2111 = vmatmul.mubr.bf16.gmra.mrb[40].mxu1 %v1915_v14  ;;  %vm1828_vm14 = vcmp.ge.f32.partialorder %v3532_v20, 0.0 }
 0x1b8   : > { %vm1829_vm15 = vcmp.ge.f32.partialorder %v3534_v22, 0.0  ;;  %v1861_v38 = vmul.f32 0.2, %v3534_v22  ;;  %v1891_v26 = vsel %vm1827_vm13, %v3530_v55, %v1859_v48 }
 0x1b9   : > { %vm1830_vm0 = vcmp.ge.f32.partialorder %v3536_v23, 0.0  ;;  %v1862_v24 = vmul.f32 0.2, %v3536_v23  ;;  %v1663_v50 = vpop.f32.mrb[16].mxu0  ;;  %v1892_v28 = vsel %vm1828_vm14, %v3532_v20, %v1860_v49 }
 0x1ba   : > { %v3537_v25 = vadd.f32 %v1663_v50, %v4538_v17  ;;  %v1665_v56 = vpop.f32.mrb[17].mxu0  ;;  %v1893_v27 = vsel %vm1829_vm15, %v3534_v22, %v1861_v38 }
 0x1bb   : > { %v3539_v51 = vadd.f32 %v1665_v56, %v4540_v18  ;;  %v1667_v57 = vpop.f32.mrb[18].mxu0  ;;  %v1894_v29 = vsel %vm1830_vm0, %v3536_v23, %v1862_v24  ;;  %v1917_v30 = vpack.c.bf16 %v1893_v27, %v1891_v26 }
 0x1bc   : > { %v3538_v58 = vadd.f32 %v3537_v25, %v4497_v59  ;;  %v3541_v31 = vadd.f32 %v1667_v57, %v4538_v17  ;;  %v1669_v3 = vpop.f32.mrb[19].mxu0  ;;  %v1918_v32 = vpack.c.bf16 %v1894_v29, %v1892_v28 }
 0x1bd   : > { %v3540_v33 = vadd.f32 %v3539_v51, %v4499_v60  ;;  %v3543_v34 = vadd.f32 %v1669_v3, %v4540_v18 }
 0x1be   : > { %v1863_v35 = vmul.f32 0.2, %v3538_v58  ;;  %v3542_v36 = vadd.f32 %v3541_v31, %v4501_v61  ;;  %2118 = vmatprep.mubr.bf16.mxu1 %v1918_v32  ;;  %vm1831_vm1 = vcmp.ge.f32.partialorder %v3538_v58, 0.0 }
 0x1bf   : > { %v1864_v37 = vmul.f32 0.2, %v3540_v33  ;;  %v3544_v39 = vadd.f32 %v3543_v34, %v4503_v62  ;;  %2119 = vmatmul.mubr.bf16.gmra.mrb[44].mxu1 %v1917_v30  ;;  %vm1832_vm2 = vcmp.ge.f32.partialorder %v3540_v33, 0.0 }
 0x1c0   : > { %vm1833_vm3 = vcmp.ge.f32.partialorder %v3542_v36, 0.0  ;;  %v1865_v59 = vmul.f32 0.2, %v3542_v36  ;;  %v1895_v42 = vsel %vm1831_vm1, %v3538_v58, %v1863_v35 }
 0x1c1   : > { %vm1834_vm4 = vcmp.ge.f32.partialorder %v3544_v39, 0.0  ;;  %v1866_v40 = vmul.f32 0.2, %v3544_v39  ;;  %v1673_v41 = vpop.f32.mrb[20].mxu0  ;;  %v1896_v44 = vsel %vm1832_vm2, %v3540_v33, %v1864_v37 }
 0x1c2   : > { %v3545_v52 = vadd.f32 %v1673_v41, %v4538_v17  ;;  %v1675_v60 = vpop.f32.mrb[21].mxu0  ;;  %v1897_v43 = vsel %vm1833_vm3, %v3542_v36, %v1865_v59 }
 0x1c3   : > { %v3547_v53 = vadd.f32 %v1675_v60, %v4540_v18  ;;  %v1677_v61 = vpop.f32.mrb[22].mxu0  ;;  %v1898_v45 = vsel %vm1834_vm4, %v3544_v39, %v1866_v40  ;;  %v1919_v46 = vpack.c.bf16 %v1897_v43, %v1895_v42 }
 0x1c4   : > { %v3546_v62 = vadd.f32 %v3545_v52, %v4505_v63  ;;  %v3549_v54 = vadd.f32 %v1677_v61, %v4538_v17  ;;  %v1679_v47 = vpop.f32.mrb[23].mxu0  ;;  %v1920_v12 = vpack.c.bf16 %v1898_v45, %v1896_v44 }
 0x1c5   : > { %v3548_v13 = vadd.f32 %v3547_v53, %v4507_v0  ;;  %v3551_v14 = vadd.f32 %v1679_v47, %v4540_v18  ;;  %v3893_v47 = vld [vmem:[%s4848_s5 + $0x38] sm:$0xff]  }
 0x1c6   : > { %v1867_v55 = vmul.f32 0.2, %v3546_v62  ;;  %v3550_v15 = vadd.f32 %v3549_v54, %v4509_v1  ;;  %2126 = vmatprep.mubr.bf16.mxu1 %v1920_v12  ;;  %vm1835_vm5 = vcmp.ge.f32.partialorder %v3546_v62, 0.0  ;;  %v3892_v54 = vld [vmem:[%s4848_s5 + $0x30] sm:$0xff]   ;;  %v3894_v12 = vld [vmem:[%s4850_s7] sm:$0xff]  }
 0x1c7   : > { %v1868_v16 = vmul.f32 0.2, %v3548_v13  ;;  %v3552_v19 = vadd.f32 %v3551_v14, %v4511_v2  ;;  %2127 = vmatmul.mubr.bf16.gmra.mrb[48].mxu1 %v1919_v46  ;;  %vm1836_vm6 = vcmp.ge.f32.partialorder %v3548_v13, 0.0  ;;  %v4630_v14 = vld [vmem:[%s4847_s4] ss:$0 sm:$0xff] }
 0x1c8   : > { %vm1837_vm7 = vcmp.ge.f32.partialorder %v3550_v15, 0.0  ;;  %v1869_v63 = vmul.f32 0.2, %v3550_v15  ;;  %v1899_v22 = vsel %vm1835_vm5, %v3546_v62, %v1867_v55  ;;  %v3891_v62 = vld [vmem:[%s4848_s5 + $0x28] sm:$0xff]  }
 0x1c9   : > { %vm1838_vm8 = vcmp.ge.f32.partialorder %v3552_v19, 0.0  ;;  %v1870_v20 = vmul.f32 0.2, %v3552_v19  ;;  %v1683_v21 = vpop.f32.mrb[24].mxu0  ;;  %v1900_v38 = vsel %vm1836_vm6, %v3548_v13, %v1868_v16 }
 0x1ca   : > { %v3553_v48 = vadd.f32 %v1683_v21, %v4538_v17  ;;  %v1685_v0 = vpop.f32.mrb[25].mxu0  ;;  %v1901_v49 = vsel %vm1837_vm7, %v3550_v15, %v1869_v63 }
 0x1cb   : > { %v3555_v23 = vadd.f32 %v1685_v0, %v4540_v18  ;;  %v1687_v1 = vpop.f32.mrb[26].mxu0  ;;  %v1902_v24 = vsel %vm1838_vm8, %v3552_v19, %v1870_v20  ;;  %v1921_v50 = vpack.c.bf16 %v1901_v49, %v1899_v22 }
 0x1cc   : > { %v3554_v2 = vadd.f32 %v3553_v48, %v4519_v4  ;;  %v3557_v25 = vadd.f32 %v1687_v1, %v4538_v17  ;;  %v1689_v56 = vpop.f32.mrb[27].mxu0  ;;  %v1922_v26 = vpack.c.bf16 %v1902_v24, %v1900_v38 }
 0x1cd   : > { %v3556_v27 = vadd.f32 %v3555_v23, %v4521_v5  ;;  %v3559_v51 = vadd.f32 %v1689_v56, %v4540_v18 }
 0x1ce   : > { %v1871_v57 = vmul.f32 0.2, %v3554_v2  ;;  %v3558_v28 = vadd.f32 %v3557_v25, %v4523_v6  ;;  %2134 = vmatprep.mubr.bf16.mxu1 %v1922_v26  ;;  %vm1839_vm9 = vcmp.ge.f32.partialorder %v3554_v2, 0.0 }
 0x1cf   : > { %v1872_v29 = vmul.f32 0.2, %v3556_v27  ;;  %v3560_v30 = vadd.f32 %v3559_v51, %v4525_v7  ;;  %2135 = vmatmul.mubr.bf16.gmra.mrb[52].mxu1 %v1921_v50  ;;  %vm1840_vm10 = vcmp.ge.f32.partialorder %v3556_v27, 0.0 }
 0x1d0   : > { %vm1841_vm11 = vcmp.ge.f32.partialorder %v3558_v28, 0.0  ;;  %v1873_v4 = vmul.f32 0.2, %v3558_v28  ;;  %v1903_v32 = vsel %vm1839_vm9, %v3554_v2, %v1871_v57 }
 0x1d1   : > { %vm1842_vm12 = vcmp.ge.f32.partialorder %v3560_v30, 0.0  ;;  %v1874_v58 = vmul.f32 0.2, %v3560_v30  ;;  %v1693_v31 = vpop.f32.mrb[28].mxu0  ;;  %v1904_v35 = vsel %vm1840_vm10, %v3556_v27, %v1872_v29 }
 0x1d2   : > { %v3561_v3 = vadd.f32 %v1693_v31, %v4538_v17  ;;  %v1695_v5 = vpop.f32.mrb[29].mxu0  ;;  %v1905_v33 = vsel %vm1841_vm11, %v3558_v28, %v1873_v4 }
 0x1d3   : > { %v3563_v34 = vadd.f32 %v1695_v5, %v4540_v18  ;;  %v1697_v6 = vpop.f32.mrb[30].mxu0  ;;  %v1906_v36 = vsel %vm1842_vm12, %v3560_v30, %v1874_v58  ;;  %v1923_v37 = vpack.c.bf16 %v1905_v33, %v1903_v32  ;;  %v3895_v5 = vld [vmem:[%s4850_s7 + $0x8] sm:$0xff]  }
 0x1d4   : > { %v3562_v7 = vadd.f32 %v3561_v3, %v4527_v8  ;;  %v3565_v39 = vadd.f32 %v1697_v6, %v4538_v17  ;;  %v1699_v59 = vpop.f32.mrb[31].mxu0  ;;  %v1924_v40 = vpack.c.bf16 %v1906_v36, %v1904_v35  ;;  %v3896_v35 = vld [vmem:[%s4850_s7 + $0x10] sm:$0xff]  }
 0x1d5   : > { %v3564_v41 = vadd.f32 %v3563_v34, %v4529_v9  ;;  %v3567_v52 = vadd.f32 %v1699_v59, %v4540_v18 }
 0x1d6   : > { %v1875_v60 = vmul.f32 0.2, %v3562_v7  ;;  %v3566_v42 = vadd.f32 %v3565_v39, %v4531_v10  ;;  %2142 = vmatprep.mubr.bf16.mxu1 %v1924_v40  ;;  %vm1843_vm13 = vcmp.ge.f32.partialorder %v3562_v7, 0.0  ;;  %v3889_v10 = vld [vmem:[%s4848_s5 + $0x18] sm:$0xff]  }
 0x1d7   : > { %v1876_v43 = vmul.f32 0.2, %v3564_v41  ;;  %v3568_v53 = vadd.f32 %v3567_v52, %v4533_v11  ;;  %2143 = vmatmul.mubr.bf16.gmra.mrb[56].mxu1 %v1923_v37  ;;  %vm1844_vm14 = vcmp.ge.f32.partialorder %v3564_v41, 0.0  ;;  %3415 = vmatprep.subr.bf16.mxu1 %v3889_v10  ;;  %v3890_v11 = vld [vmem:[%s4848_s5 + $0x20] sm:$0xff]  }
 0x1d8   : > { %vm1845_vm15 = vcmp.ge.f32.partialorder %v3566_v42, 0.0  ;;  %v1877_v8 = vmul.f32 0.2, %v3566_v42  ;;  %v1907_v61 = vsel %vm1843_vm13, %v3562_v7, %v1875_v60  ;;  %3416 = vmatpush3.bf16.msra.mxu1 %v3889_v10 }
 0x1d9   : > { %vm1846_vm0 = vcmp.ge.f32.partialorder %v3568_v53, 0.0  ;;  %v1878_v17 = vmul.f32 0.2, %v3568_v53  ;;  %v1908_v45 = vsel %vm1844_vm14, %v3564_v41, %v1876_v43  ;;  %3417 = vmatprep.subr.bf16.mxu1 %v3890_v11 }
 0x1da   : > { %v1909_v44 = vsel %vm1845_vm15, %v3566_v42, %v1877_v8  ;;  %v3897_v42 = vld [vmem:[%s4850_s7 + $0x18] sm:$0xff]  }
 0x1db   : > { %v1910_v9 = vsel %vm1846_vm0, %v3568_v53, %v1878_v17  ;;  %v1925_v46 = vpack.c.bf16 %v1909_v44, %v1907_v61  ;;  %v3898_v61 = vld [vmem:[%s4850_s7 + $0x20] sm:$0xff]  }
 0x1dc   : > { %v1926_v18 = vpack.c.bf16 %v1910_v9, %v1908_v45  ;;  %3418 = vmatpush3.bf16.msra.mxu1 %v3890_v11 }
 0x1dd   : > { %3419 = vmatprep.subr.bf16.mxu1 %v3891_v62 }
 0x1de   : > { %2150 = vmatprep.mubr.bf16.mxu1 %v1926_v18 }
 0x1df   : > { %2151 = vmatmul.mubr.bf16.gmra.mrb[60].mxu1 %v1925_v46 }
 0x1e0   : > { %3420 = vmatpush3.bf16.msra.mxu1 %v3891_v62 }
 0x1e1   : > { %3421 = vmatprep.subr.bf16.mxu1 %v3892_v54 }
 0x1e4   : > { %3422 = vmatpush3.bf16.msra.mxu1 %v3892_v54 }
 0x1e5   : > { %3423 = vmatprep.subr.bf16.mxu1 %v3893_v47 }
 0x1e8   : > { %3424 = vmatpush3.bf16.msra.mxu1 %v3893_v47 }
 0x1e9   : > { %3441 = vmatprep.subr.bf16.mxu1 %v3894_v12 }
 0x27a   : > { %v3313_v13 = vpop.f32.mrb[32].mxu1 }
 0x27b   : > { %v3314_v55 = vpop.f32.mrb[33].mxu1 }
 0x27c   : > { %v3315_v15 = vadd.f32 %v3314_v55, %v3313_v13  ;;  %v3316_v16 = vpop.f32.mrb[34].mxu1 }
 0x27d   : > { %v3317_v19 = vpop.f32.mrb[35].mxu1 }
 0x27e   : > { %v2097_v63 = vadd.f32 %v3315_v15, %v4630_v14  ;;  %v3318_v20 = vadd.f32 %v3317_v19, %v3316_v16 }
 0x280   : > { %v2175_v21 = vmul.f32 0.2, %v2097_v63  ;;  %v2100_v48 = vadd.f32 %v3318_v20, %v4630_v14  ;;  %vm2159_vm1 = vcmp.ge.f32.partialorder %v2097_v63, 0.0 }
 0x282   : > { %vm2160_vm2 = vcmp.ge.f32.partialorder %v2100_v48, 0.0  ;;  %v2176_v0 = vmul.f32 0.2, %v2100_v48  ;;  %v3319_v22 = vpop.f32.mrb[36].mxu1  ;;  %v2191_v38 = vsel %vm2159_vm1, %v2097_v63, %v2175_v21 }
 0x283   : > { %v3320_v49 = vpop.f32.mrb[37].mxu1 }
 0x284   : > { %v3321_v23 = vadd.f32 %v3320_v49, %v3319_v22  ;;  %v3322_v1 = vpop.f32.mrb[38].mxu1  ;;  %v2192_v24 = vsel %vm2160_vm2, %v2100_v48, %v2176_v0 }
 0x285   : > { %v3323_v50 = vpop.f32.mrb[39].mxu1  ;;  %v2207_v2 = vpack.c.bf16 %v2192_v24, %v2191_v38 }
 0x286   : > { %v2105_v25 = vadd.f32 %v3321_v23, %v4630_v14  ;;  %v3324_v56 = vadd.f32 %v3323_v50, %v3322_v1 }
 0x287   : > { %3425 = vmatprep.mubr.bf16.mxu1 %v2207_v2 }
 0x288   : > { %v2177_v26 = vmul.f32 0.2, %v2105_v25  ;;  %v2108_v27 = vadd.f32 %v3324_v56, %v4630_v14  ;;  %vm2161_vm3 = vcmp.ge.f32.partialorder %v2105_v25, 0.0 }
 0x28a   : > { %vm2162_vm4 = vcmp.ge.f32.partialorder %v2108_v27, 0.0  ;;  %v2178_v51 = vmul.f32 0.2, %v2108_v27  ;;  %v3325_v57 = vpop.f32.mrb[40].mxu1  ;;  %v2193_v29 = vsel %vm2161_vm3, %v2105_v25, %v2177_v26 }
 0x28b   : > { %v3326_v28 = vpop.f32.mrb[41].mxu1 }
 0x28c   : > { %v2194_v30 = vsel %vm2162_vm4, %v2108_v27, %v2178_v51  ;;  %v3327_v4 = vadd.f32 %v3326_v28, %v3325_v57  ;;  %v3328_v58 = vpop.f32.mrb[42].mxu1 }
 0x28d   : > { %v2208_v31 = vpack.c.bf16 %v2194_v30, %v2193_v29  ;;  %v3329_v3 = vpop.f32.mrb[43].mxu1 }
 0x28e   : > { %v2113_v32 = vadd.f32 %v3327_v4, %v4630_v14  ;;  %v3330_v33 = vadd.f32 %v3329_v3, %v3328_v58 }
 0x28f   : > { %3426 = vmatmul.mubr.bf16.vlgmr.msra.gmra.mrb[64].mxu1 %v2208_v31 }
 0x290   : > { %v2179_v34 = vmul.f32 0.2, %v2113_v32  ;;  %v2116_v6 = vadd.f32 %v3330_v33, %v4630_v14  ;;  %3442 = vmatpush3.bf16.msra.mxu1 %v3894_v12  ;;  %vm2163_vm5 = vcmp.ge.f32.partialorder %v2113_v32, 0.0 }
 0x291   : > { %3443 = vmatprep.subr.bf16.mxu1 %v3895_v5 }
 0x292   : > { %vm2164_vm6 = vcmp.ge.f32.partialorder %v2116_v6, 0.0  ;;  %v2180_v36 = vmul.f32 0.2, %v2116_v6  ;;  %v3331_v37 = vpop.f32.mrb[44].mxu1  ;;  %v2195_v40 = vsel %vm2163_vm5, %v2113_v32, %v2179_v34 }
 0x293   : > { %v3332_v7 = vpop.f32.mrb[45].mxu1 }
 0x294   : > { %v3333_v39 = vadd.f32 %v3332_v7, %v3331_v37  ;;  %v3334_v59 = vpop.f32.mrb[46].mxu1  ;;  %v2196_v41 = vsel %vm2164_vm6, %v2116_v6, %v2180_v36  ;;  %3444 = vmatpush3.bf16.msra.mxu1 %v3895_v5 }
 0x295   : > { %v3335_v52 = vpop.f32.mrb[47].mxu1  ;;  %v2209_v60 = vpack.c.bf16 %v2196_v41, %v2195_v40  ;;  %3445 = vmatprep.subr.bf16.mxu1 %v3896_v35 }
 0x296   : > { %v2121_v43 = vadd.f32 %v3333_v39, %v4630_v14  ;;  %v3336_v53 = vadd.f32 %v3335_v52, %v3334_v59 }
 0x297   : > { %3429 = vmatprep.mubr.bf16.mxu1 %v2209_v60  ;;  %v3899_v60 = vld [vmem:[%s4850_s7 + $0x28] sm:$0xff]  }
 0x298   : > { %v2181_v8 = vmul.f32 0.2, %v2121_v43  ;;  %v2124_v17 = vadd.f32 %v3336_v53, %v4630_v14  ;;  %3446 = vmatpush3.bf16.msra.mxu1 %v3896_v35  ;;  %vm2165_vm7 = vcmp.ge.f32.partialorder %v2121_v43, 0.0  ;;  %v4675_v53 = vld [vmem:[%s4849_s6] ss:$0 sm:$0xff] }
 0x299   : > { %3447 = vmatprep.subr.bf16.mxu1 %v3897_v42 }
 0x29a   : > { %vm2166_vm8 = vcmp.ge.f32.partialorder %v2124_v17, 0.0  ;;  %v2182_v44 = vmul.f32 0.2, %v2124_v17  ;;  %v3337_v45 = vpop.f32.mrb[48].mxu1  ;;  %v2197_v10 = vsel %vm2165_vm7, %v2121_v43, %v2181_v8  ;;  %v3902_v43 = vld [vmem:[%s4852_s9] sm:$0xff]  }
 0x29b   : > { %v3338_v9 = vpop.f32.mrb[49].mxu1 }
 0x29c   : > { %v3339_v46 = vadd.f32 %v3338_v9, %v3337_v45  ;;  %v3340_v18 = vpop.f32.mrb[50].mxu1  ;;  %v2198_v11 = vsel %vm2166_vm8, %v2124_v17, %v2182_v44  ;;  %3448 = vmatpush3.bf16.msra.mxu1 %v3897_v42  ;;  %v3900_v42 = vld [vmem:[%s4850_s7 + $0x30] sm:$0xff]  }
 0x29d   : > { %v3341_v62 = vpop.f32.mrb[51].mxu1  ;;  %v2210_v54 = vpack.c.bf16 %v2198_v11, %v2197_v10  ;;  %3449 = vmatprep.subr.bf16.mxu1 %v3898_v61 }
 0x29e   : > { %v2129_v47 = vadd.f32 %v3339_v46, %v4630_v14  ;;  %v3342_v12 = vadd.f32 %v3341_v62, %v3340_v18 }
 0x29f   : > { %3430 = vmatmul.mubr.bf16.gmra.mrb[68].mxu1 %v2210_v54 }
 0x2a0   : > { %v2183_v13 = vmul.f32 0.2, %v2129_v47  ;;  %v2132_v55 = vadd.f32 %v3342_v12, %v4630_v14  ;;  %3450 = vmatpush3.bf16.msra.mxu1 %v3898_v61  ;;  %vm2167_vm9 = vcmp.ge.f32.partialorder %v2129_v47, 0.0 }
 0x2a1   : > { %3451 = vmatprep.subr.bf16.mxu1 %v3899_v60 }
 0x2a2   : > { %vm2168_vm10 = vcmp.ge.f32.partialorder %v2132_v55, 0.0  ;;  %v2184_v15 = vmul.f32 0.2, %v2132_v55  ;;  %v3343_v16 = vpop.f32.mrb[52].mxu1  ;;  %v2199_v21 = vsel %vm2167_vm9, %v2129_v47, %v2183_v13 }
 0x2a3   : > { %v3344_v19 = vpop.f32.mrb[53].mxu1 }
 0x2a4   : > { %v3345_v63 = vadd.f32 %v3344_v19, %v3343_v16  ;;  %v3346_v20 = vpop.f32.mrb[54].mxu1  ;;  %v2200_v48 = vsel %vm2168_vm10, %v2132_v55, %v2184_v15  ;;  %3452 = vmatpush3.bf16.msra.mxu1 %v3899_v60  ;;  %v3903_v19 = vld [vmem:[%s4852_s9 + $0x8] sm:$0xff]  }
 0x2a5   : > { %v3347_v0 = vpop.f32.mrb[55].mxu1  ;;  %v2211_v22 = vpack.c.bf16 %v2200_v48, %v2199_v21  ;;  %3453 = vmatprep.subr.bf16.mxu1 %v3900_v42 }
 0x2a6   : > { %v2137_v49 = vadd.f32 %v3345_v63, %v4630_v14  ;;  %v3348_v23 = vadd.f32 %v3347_v0, %v3346_v20  ;;  %v3904_v63 = vld [vmem:[%s4852_s9 + $0x10] sm:$0xff]  }
 0x2a7   : > { %3433 = vmatprep.mubr.bf16.mxu1 %v2211_v22 }
 0x2a8   : > { %v2185_v1 = vmul.f32 0.2, %v2137_v49  ;;  %v2140_v38 = vadd.f32 %v3348_v23, %v4630_v14  ;;  %vm2169_vm11 = vcmp.ge.f32.partialorder %v2137_v49, 0.0  ;;  %3454 = vmatpush3.bf16.msra.mxu1 %v3900_v42 }
 0x2aa   : > { %vm2170_vm12 = vcmp.ge.f32.partialorder %v2140_v38, 0.0  ;;  %v2186_v24 = vmul.f32 0.2, %v2140_v38  ;;  %v3349_v50 = vpop.f32.mrb[56].mxu1  ;;  %v2201_v26 = vsel %vm2169_vm11, %v2137_v49, %v2185_v1  ;;  %v3905_v49 = vld [vmem:[%s4852_s9 + $0x18] sm:$0xff]  }
 0x2ab   : > { %v3350_v2 = vpop.f32.mrb[57].mxu1 }
 0x2ac   : > { %v3351_v25 = vadd.f32 %v3350_v2, %v3349_v50  ;;  %v3352_v56 = vpop.f32.mrb[58].mxu1  ;;  %v2202_v27 = vsel %vm2170_vm12, %v2140_v38, %v2186_v24 }
 0x2ad   : > { %v3353_v51 = vpop.f32.mrb[59].mxu1  ;;  %v2212_v57 = vpack.c.bf16 %v2202_v27, %v2201_v26 }
 0x2ae   : > { %v2145_v28 = vadd.f32 %v3351_v25, %v4630_v14  ;;  %v3354_v29 = vadd.f32 %v3353_v51, %v3352_v56  ;;  %v3906_v56 = vld [vmem:[%s4852_s9 + $0x20] sm:$0xff]  }
 0x2af   : > { %3434 = vmatmul.mubr.bf16.gmra.mrb[72].mxu1 %v2212_v57 }
 0x2b0   : > { %v2187_v30 = vmul.f32 0.2, %v2145_v28  ;;  %v2148_v4 = vadd.f32 %v3354_v29, %v4630_v14  ;;  %vm2171_vm13 = vcmp.ge.f32.partialorder %v2145_v28, 0.0 }
 0x2b2   : > { %vm2172_vm14 = vcmp.ge.f32.partialorder %v2148_v4, 0.0  ;;  %v2188_v58 = vmul.f32 0.2, %v2148_v4  ;;  %v3355_v31 = vpop.f32.mrb[60].mxu1  ;;  %v2203_v33 = vsel %vm2171_vm13, %v2145_v28, %v2187_v30 }
 0x2b3   : > { %v3356_v3 = vpop.f32.mrb[61].mxu1 }
 0x2b4   : > { %v3357_v5 = vadd.f32 %v3356_v3, %v3355_v31  ;;  %v3358_v32 = vpop.f32.mrb[62].mxu1  ;;  %v2204_v34 = vsel %vm2172_vm14, %v2148_v4, %v2188_v58 }
 0x2b5   : > { %v3359_v6 = vpop.f32.mrb[63].mxu1  ;;  %v2213_v35 = vpack.c.bf16 %v2204_v34, %v2203_v33 }
 0x2b6   : > { %v2153_v36 = vadd.f32 %v3357_v5, %v4630_v14  ;;  %v3360_v37 = vadd.f32 %v3359_v6, %v3358_v32 }
 0x2b7   : > { %3437 = vmatprep.mubr.bf16.mxu1 %v2213_v35 }
 0x2b8   : > { %v2189_v7 = vmul.f32 0.2, %v2153_v36  ;;  %v2156_v39 = vadd.f32 %v3360_v37, %v4630_v14  ;;  %vm2173_vm15 = vcmp.ge.f32.partialorder %v2153_v36, 0.0  ;;  %v3901_v14 = vld [vmem:[%s4850_s7 + $0x38] sm:$0xff]  }
 0x2b9   : > { %3455 = vmatprep.subr.bf16.mxu1 %v3901_v14 }
 0x2ba   : > { %vm2174_vm0 = vcmp.ge.f32.partialorder %v2156_v39, 0.0  ;;  %v2190_v59 = vmul.f32 0.2, %v2156_v39  ;;  %v2205_v40 = vsel %vm2173_vm15, %v2153_v36, %v2189_v7  ;;  %3456 = vmatpush3.bf16.msra.mxu1 %v3901_v14 }
 0x2bb   : > { %3473 = vmatprep.subr.bf16.mxu1 %v3902_v43 }
 0x2bc   : > { %v2206_v41 = vsel %vm2174_vm0, %v2156_v39, %v2190_v59 }
 0x2bd   : > { %v2214_v52 = vpack.c.bf16 %v2206_v41, %v2205_v40 }
 0x2bf   : > { %3438 = vmatmul.mubr.bf16.gmra.mrb[76].mxu1 %v2214_v52 }
 0x362   : > { %v3427_v8 = vpop.f32.mrb[64].mxu1 }
 0x363   : > { %v2329_v17 = vadd.f32 %v3427_v8, %v4675_v53  ;;  %v2320_v61 = vpop.f32.mrb[65].mxu1 }
 0x364   : > { %v2321_v44 = vadd.f32 %v4675_v53, %v2320_v61  ;;  %v3428_v45 = vpop.f32.mrb[66].mxu1 }
 0x365   : > { %v2401_v9 = vmul.f32 0.2, %v2329_v17  ;;  %v2332_v46 = vadd.f32 %v3428_v45, %v4675_v53  ;;  %v2323_v18 = vpop.f32.mrb[67].mxu1  ;;  %vm2385_vm1 = vcmp.ge.f32.partialorder %v2329_v17, 0.0 }
 0x366   : > { %v2399_v10 = vmul.f32 0.2, %v2321_v44  ;;  %v2324_v11 = vadd.f32 %v4675_v53, %v2323_v18  ;;  %vm2383_vm2 = vcmp.ge.f32.partialorder %v2321_v44, 0.0 }
 0x367   : > { %vm2386_vm3 = vcmp.ge.f32.partialorder %v2332_v46, 0.0  ;;  %v2402_v62 = vmul.f32 0.2, %v2332_v46  ;;  %v2417_v47 = vsel %vm2385_vm1, %v2329_v17, %v2401_v9 }
 0x368   : > { %vm2384_vm4 = vcmp.ge.f32.partialorder %v2324_v11, 0.0  ;;  %v2400_v54 = vmul.f32 0.2, %v2324_v11  ;;  %v2415_v55 = vsel %vm2383_vm2, %v2321_v44, %v2399_v10 }
 0x369   : > { %v2418_v12 = vsel %vm2386_vm3, %v2332_v46, %v2402_v62 }
 0x36a   : > { %v2432_v13 = vpack.c.bf16 %v2418_v12, %v2417_v47  ;;  %v2416_v15 = vsel %vm2384_vm4, %v2324_v11, %v2400_v54  ;;  %v3907_v12 = vld [vmem:[%s4852_s9 + $0x28] sm:$0xff]  }
 0x36b   : > { %v2431_v16 = vpack.c.bf16 %v2416_v15, %v2415_v55  ;;  %v4717_v55 = vld [vmem:[%s4851_s8] ss:$0 sm:$0xff] }
 0x36d   : > { %3457 = vmatprep.mubr.bf16.mxu1 %v2431_v16 }
 0x36e   : > { %3458 = vmatmul.mubr.bf16.vlgmr.msra.gmra.mrb[80].mxu1 %v2432_v13  ;;  %v3909_v13 = vld [vmem:[%s4852_s9 + $0x38] sm:$0xff]  }
 0x36f   : > { %3474 = vmatpush3.bf16.msra.mxu1 %v3902_v43 }
 0x370   : > { %3475 = vmatprep.subr.bf16.mxu1 %v3903_v19 }
 0x372   : > { %v3431_v20 = vpop.f32.mrb[68].mxu1 }
 0x373   : > { %v2345_v21 = vadd.f32 %v3431_v20, %v4675_v53  ;;  %v2336_v48 = vpop.f32.mrb[69].mxu1  ;;  %3476 = vmatpush3.bf16.msra.mxu1 %v3903_v19 }
 0x374   : > { %v2337_v0 = vadd.f32 %v4675_v53, %v2336_v48  ;;  %v3432_v22 = vpop.f32.mrb[70].mxu1  ;;  %3477 = vmatprep.subr.bf16.mxu1 %v3904_v63 }
 0x375   : > { %v2405_v23 = vmul.f32 0.2, %v2345_v21  ;;  %v2348_v1 = vadd.f32 %v3432_v22, %v4675_v53  ;;  %v2339_v38 = vpop.f32.mrb[71].mxu1  ;;  %vm2389_vm5 = vcmp.ge.f32.partialorder %v2345_v21, 0.0 }
 0x376   : > { %v2403_v24 = vmul.f32 0.2, %v2337_v0  ;;  %v2340_v50 = vadd.f32 %v4675_v53, %v2339_v38  ;;  %vm2387_vm6 = vcmp.ge.f32.partialorder %v2337_v0, 0.0 }
 0x377   : > { %vm2390_vm7 = vcmp.ge.f32.partialorder %v2348_v1, 0.0  ;;  %v2406_v2 = vmul.f32 0.2, %v2348_v1  ;;  %3478 = vmatpush3.bf16.msra.mxu1 %v3904_v63  ;;  %v2421_v26 = vsel %vm2389_vm5, %v2345_v21, %v2405_v23 }
 0x378   : > { %vm2388_vm8 = vcmp.ge.f32.partialorder %v2340_v50, 0.0  ;;  %v2404_v25 = vmul.f32 0.2, %v2340_v50  ;;  %3479 = vmatprep.subr.bf16.mxu1 %v3905_v49  ;;  %v2419_v51 = vsel %vm2387_vm6, %v2337_v0, %v2403_v24 }
 0x379   : > { %v2422_v27 = vsel %vm2390_vm7, %v2348_v1, %v2406_v2 }
 0x37a   : > { %v2420_v57 = vsel %vm2388_vm8, %v2340_v50, %v2404_v25  ;;  %v2434_v28 = vpack.c.bf16 %v2422_v27, %v2421_v26 }
 0x37b   : > { %v2433_v29 = vpack.c.bf16 %v2420_v57, %v2419_v51  ;;  %3480 = vmatpush3.bf16.msra.mxu1 %v3905_v49 }
 0x37c   : > { %3481 = vmatprep.subr.bf16.mxu1 %v3906_v56 }
 0x37d   : > { %3461 = vmatprep.mubr.bf16.mxu1 %v2433_v29 }
 0x37e   : > { %3462 = vmatmul.mubr.bf16.gmra.mrb[84].mxu1 %v2434_v28 }
 0x37f   : > { %3482 = vmatpush3.bf16.msra.mxu1 %v3906_v56 }
 0x380   : > { %3483 = vmatprep.subr.bf16.mxu1 %v3907_v12 }
 0x382   : > { %v3435_v30 = vpop.f32.mrb[72].mxu1 }
 0x383   : > { %v2361_v4 = vadd.f32 %v3435_v30, %v4675_v53  ;;  %v2352_v58 = vpop.f32.mrb[73].mxu1  ;;  %3484 = vmatpush3.bf16.msra.mxu1 %v3907_v12 }
 0x384   : > { %v2353_v31 = vadd.f32 %v4675_v53, %v2352_v58  ;;  %v3436_v3 = vpop.f32.mrb[74].mxu1 }
 0x385   : > { %v2409_v5 = vmul.f32 0.2, %v2361_v4  ;;  %v2364_v32 = vadd.f32 %v3436_v3, %v4675_v53  ;;  %v2355_v33 = vpop.f32.mrb[75].mxu1  ;;  %vm2393_vm9 = vcmp.ge.f32.partialorder %v2361_v4, 0.0 }
 0x386   : > { %v2407_v34 = vmul.f32 0.2, %v2353_v31  ;;  %v2356_v6 = vadd.f32 %v4675_v53, %v2355_v33  ;;  %vm2391_vm10 = vcmp.ge.f32.partialorder %v2353_v31, 0.0 }
 0x387   : > { %vm2394_vm11 = vcmp.ge.f32.partialorder %v2364_v32, 0.0  ;;  %v2410_v35 = vmul.f32 0.2, %v2364_v32  ;;  %v2425_v37 = vsel %vm2393_vm9, %v2361_v4, %v2409_v5 }
 0x388   : > { %vm2392_vm12 = vcmp.ge.f32.partialorder %v2356_v6, 0.0  ;;  %v2408_v36 = vmul.f32 0.2, %v2356_v6  ;;  %v2423_v39 = vsel %vm2391_vm10, %v2353_v31, %v2407_v34 }
 0x389   : > { %v2426_v7 = vsel %vm2394_vm11, %v2364_v32, %v2410_v35 }
 0x38a   : > { %v2424_v59 = vsel %vm2392_vm12, %v2356_v6, %v2408_v36  ;;  %v2436_v40 = vpack.c.bf16 %v2426_v7, %v2425_v37 }
 0x38b   : > { %v2435_v41 = vpack.c.bf16 %v2424_v59, %v2423_v39 }
 0x38d   : > { %3465 = vmatprep.mubr.bf16.mxu1 %v2435_v41 }
 0x38e   : > { %3466 = vmatmul.mubr.bf16.gmra.mrb[88].mxu1 %v2436_v40 }
 0x392   : > { %v3439_v52 = vpop.f32.mrb[76].mxu1 }
 0x393   : > { %v2377_v60 = vadd.f32 %v3439_v52, %v4675_v53  ;;  %v2368_v42 = vpop.f32.mrb[77].mxu1 }
 0x394   : > { %v2369_v14 = vadd.f32 %v4675_v53, %v2368_v42  ;;  %v3440_v43 = vpop.f32.mrb[78].mxu1 }
 0x395   : > { %v2413_v8 = vmul.f32 0.2, %v2377_v60  ;;  %v2380_v17 = vadd.f32 %v3440_v43, %v4675_v53  ;;  %v2371_v61 = vpop.f32.mrb[79].mxu1  ;;  %vm2397_vm13 = vcmp.ge.f32.partialorder %v2377_v60, 0.0 }
 0x396   : > { %v2411_v44 = vmul.f32 0.2, %v2369_v14  ;;  %v2372_v45 = vadd.f32 %v4675_v53, %v2371_v61  ;;  %vm2395_vm14 = vcmp.ge.f32.partialorder %v2369_v14, 0.0  ;;  %v3908_v53 = vld [vmem:[%s4852_s9 + $0x30] sm:$0xff]  }
 0x397   : > { %vm2398_vm15 = vcmp.ge.f32.partialorder %v2380_v17, 0.0  ;;  %v2414_v9 = vmul.f32 0.2, %v2380_v17  ;;  %v2429_v18 = vsel %vm2397_vm13, %v2377_v60, %v2413_v8  ;;  %3485 = vmatprep.subr.bf16.mxu1 %v3908_v53 }
 0x398   : > { %vm2396_vm0 = vcmp.ge.f32.partialorder %v2372_v45, 0.0  ;;  %v2412_v46 = vmul.f32 0.2, %v2372_v45  ;;  %v2427_v11 = vsel %vm2395_vm14, %v2369_v14, %v2411_v44  ;;  %3486 = vmatpush3.bf16.msra.mxu1 %v3908_v53 }
 0x399   : > { %v2430_v10 = vsel %vm2398_vm15, %v2380_v17, %v2414_v9  ;;  %3487 = vmatprep.subr.bf16.mxu1 %v3909_v13 }
 0x39a   : > { %v2428_v62 = vsel %vm2396_vm0, %v2372_v45, %v2412_v46  ;;  %v2438_v54 = vpack.c.bf16 %v2430_v10, %v2429_v18 }
 0x39b   : > { %v2437_v47 = vpack.c.bf16 %v2428_v62, %v2427_v11 }
 0x39c   : > { %3488 = vmatpush3.bf16.msra.mxu1 %v3909_v13 }
 0x39d   : > { %3469 = vmatprep.mubr.bf16.mxu1 %v2437_v47 }
 0x39e   : > { %3470 = vmatmul.mubr.bf16.gmra.mrb[92].mxu1 %v2438_v54 }
 0x441   : > { %v3459_v15 = vpop.f32.mrb[80].mxu1 }
 0x442   : > { %v2553_v16 = vadd.f32 %v3459_v15, %v4717_v55  ;;  %v2544_v19 = vpop.f32.mrb[81].mxu1 }
 0x443   : > { %v2545_v63 = vadd.f32 %v4717_v55, %v2544_v19  ;;  %v3460_v20 = vpop.f32.mrb[82].mxu1 }
 0x444   : > { %v2625_v21 = vmul.f32 0.2, %v2553_v16  ;;  %v2556_v48 = vadd.f32 %v3460_v20, %v4717_v55  ;;  %v2547_v0 = vpop.f32.mrb[83].mxu1  ;;  %vm2609_vm1 = vcmp.ge.f32.partialorder %v2553_v16, 0.0 }
 0x445   : > { %v2623_v22 = vmul.f32 0.2, %v2545_v63  ;;  %v2548_v49 = vadd.f32 %v4717_v55, %v2547_v0  ;;  %vm2607_vm2 = vcmp.ge.f32.partialorder %v2545_v63, 0.0 }
 0x446   : > { %vm2610_vm3 = vcmp.ge.f32.partialorder %v2556_v48, 0.0  ;;  %v2626_v23 = vmul.f32 0.2, %v2556_v48  ;;  %v2641_v38 = vsel %vm2609_vm1, %v2553_v16, %v2625_v21  ;;  %vm3007_vm1 = vcmask 7168  }
 0x447   : > { %vm2608_vm4 = vcmp.ge.f32.partialorder %v2548_v49, 0.0  ;;  %v2624_v1 = vmul.f32 0.2, %v2548_v49  ;;  %v2639_v2 = vsel %vm2607_vm2, %v2545_v63, %v2623_v22 }
 0x448   : > { %v2642_v24 = vsel %vm2610_vm3, %v2556_v48, %v2626_v23 }
 0x449   : > { %v2656_v50 = vpack.c.bf16 %v2642_v24, %v2641_v38  ;;  %v2640_v25 = vsel %vm2608_vm4, %v2548_v49, %v2624_v1  ;;  %v3286_v49 = vld [vmem:[%s4853_s10] ss:$0 sm:$0xff] }
 0x44a   : > { %v2655_v56 = vpack.c.bf16 %v2640_v25, %v2639_v2 }
 0x44c   : > { %3489 = vmatprep.mubr.bf16.mxu1 %v2655_v56 }
 0x44d   : > { %3490 = vmatmul.mubr.bf16.vlgmr.msra.gmra.mrb[96].mxu1 %v2656_v50 }
 0x451   : > { %v3463_v26 = vpop.f32.mrb[84].mxu1 }
 0x452   : > { %v2569_v27 = vadd.f32 %v3463_v26, %v4717_v55  ;;  %v2560_v51 = vpop.f32.mrb[85].mxu1 }
 0x453   : > { %v2561_v57 = vadd.f32 %v4717_v55, %v2560_v51  ;;  %v3464_v28 = vpop.f32.mrb[86].mxu1 }
 0x454   : > { %v2629_v29 = vmul.f32 0.2, %v2569_v27  ;;  %v2572_v30 = vadd.f32 %v3464_v28, %v4717_v55  ;;  %v2563_v4 = vpop.f32.mrb[87].mxu1  ;;  %vm2613_vm5 = vcmp.ge.f32.partialorder %v2569_v27, 0.0 }
 0x455   : > { %v2627_v58 = vmul.f32 0.2, %v2561_v57  ;;  %v2564_v31 = vadd.f32 %v4717_v55, %v2563_v4  ;;  %vm2611_vm6 = vcmp.ge.f32.partialorder %v2561_v57, 0.0 }
 0x456   : > { %vm2614_vm7 = vcmp.ge.f32.partialorder %v2572_v30, 0.0  ;;  %v2630_v3 = vmul.f32 0.2, %v2572_v30  ;;  %v2645_v32 = vsel %vm2613_vm5, %v2569_v27, %v2629_v29 }
 0x457   : > { %vm2612_vm8 = vcmp.ge.f32.partialorder %v2564_v31, 0.0  ;;  %v2628_v5 = vmul.f32 0.2, %v2564_v31  ;;  %v2643_v34 = vsel %vm2611_vm6, %v2561_v57, %v2627_v58 }
 0x458   : > { %v2646_v33 = vsel %vm2614_vm7, %v2572_v30, %v2630_v3 }
 0x459   : > { %v2644_v6 = vsel %vm2612_vm8, %v2564_v31, %v2628_v5  ;;  %v2658_v35 = vpack.c.bf16 %v2646_v33, %v2645_v32 }
 0x45a   : > { %v2657_v36 = vpack.c.bf16 %v2644_v6, %v2643_v34 }
 0x45c   : > { %3493 = vmatprep.mubr.bf16.mxu1 %v2657_v36 }
 0x45d   : > { %3494 = vmatmul.mubr.bf16.gmra.mrb[100].mxu1 %v2658_v35 }
 0x461   : > { %v3467_v37 = vpop.f32.mrb[88].mxu1 }
 0x462   : > { %v2585_v7 = vadd.f32 %v3467_v37, %v4717_v55  ;;  %v2576_v39 = vpop.f32.mrb[89].mxu1 }
 0x463   : > { %v2577_v59 = vadd.f32 %v4717_v55, %v2576_v39  ;;  %v3468_v40 = vpop.f32.mrb[90].mxu1 }
 0x464   : > { %v2633_v41 = vmul.f32 0.2, %v2585_v7  ;;  %v2588_v52 = vadd.f32 %v3468_v40, %v4717_v55  ;;  %v2579_v60 = vpop.f32.mrb[91].mxu1  ;;  %vm2617_vm9 = vcmp.ge.f32.partialorder %v2585_v7, 0.0 }
 0x465   : > { %v2631_v42 = vmul.f32 0.2, %v2577_v59  ;;  %v2580_v14 = vadd.f32 %v4717_v55, %v2579_v60  ;;  %vm2615_vm10 = vcmp.ge.f32.partialorder %v2577_v59, 0.0 }
 0x466   : > { %vm2618_vm11 = vcmp.ge.f32.partialorder %v2588_v52, 0.0  ;;  %v2634_v43 = vmul.f32 0.2, %v2588_v52  ;;  %v2649_v17 = vsel %vm2617_vm9, %v2585_v7, %v2633_v41 }
 0x467   : > { %vm2616_vm12 = vcmp.ge.f32.partialorder %v2580_v14, 0.0  ;;  %v2632_v8 = vmul.f32 0.2, %v2580_v14  ;;  %v2647_v44 = vsel %vm2615_vm10, %v2577_v59, %v2631_v42 }
 0x468   : > { %v2650_v61 = vsel %vm2618_vm11, %v2588_v52, %v2634_v43 }
 0x469   : > { %v2648_v45 = vsel %vm2616_vm12, %v2580_v14, %v2632_v8  ;;  %v2660_v9 = vpack.c.bf16 %v2650_v61, %v2649_v17 }
 0x46a   : > { %v2659_v46 = vpack.c.bf16 %v2648_v45, %v2647_v44 }
 0x46c   : > { %3497 = vmatprep.mubr.bf16.mxu1 %v2659_v46 }
 0x46d   : > { %3498 = vmatmul.mubr.bf16.gmra.mrb[104].mxu1 %v2660_v9 }
 0x471   : > { %v3471_v18 = vpop.f32.mrb[92].mxu1 }
 0x472   : > { %v2601_v10 = vadd.f32 %v3471_v18, %v4717_v55  ;;  %v2592_v11 = vpop.f32.mrb[93].mxu1 }
 0x473   : > { %v2593_v62 = vadd.f32 %v4717_v55, %v2592_v11  ;;  %v3472_v54 = vpop.f32.mrb[94].mxu1 }
 0x474   : > { %v2637_v47 = vmul.f32 0.2, %v2601_v10  ;;  %v2604_v12 = vadd.f32 %v3472_v54, %v4717_v55  ;;  %v2595_v53 = vpop.f32.mrb[95].mxu1  ;;  %vm2621_vm13 = vcmp.ge.f32.partialorder %v2601_v10, 0.0 }
 0x475   : > { %v2635_v13 = vmul.f32 0.2, %v2593_v62  ;;  %v2596_v15 = vadd.f32 %v4717_v55, %v2595_v53  ;;  %vm2619_vm14 = vcmp.ge.f32.partialorder %v2593_v62, 0.0 }
 0x476   : > { %vm2622_vm15 = vcmp.ge.f32.partialorder %v2604_v12, 0.0  ;;  %v2638_v16 = vmul.f32 0.2, %v2604_v12  ;;  %v2653_v63 = vsel %vm2621_vm13, %v2601_v10, %v2637_v47 }
 0x477   : > { %vm2620_vm0 = vcmp.ge.f32.partialorder %v2596_v15, 0.0  ;;  %v2636_v19 = vmul.f32 0.2, %v2596_v15  ;;  %v2651_v21 = vsel %vm2619_vm14, %v2593_v62, %v2635_v13 }
 0x478   : > { %v2654_v20 = vsel %vm2622_vm15, %v2604_v12, %v2638_v16 }
 0x479   : > { %v2652_v48 = vsel %vm2620_vm0, %v2596_v15, %v2636_v19  ;;  %v2662_v0 = vpack.c.bf16 %v2654_v20, %v2653_v63 }
 0x47a   : > { %v2661_v22 = vpack.c.bf16 %v2652_v48, %v2651_v21 }
 0x47c   : > { %3501 = vmatprep.mubr.bf16.mxu1 %v2661_v22 }
 0x47d   : > { %3502 = vmatmul.mubr.bf16.gmra.mrb[108].mxu1 %v2662_v0 }
 0x520   : > { %v3491_v23 = vpop.f32.mrb[96].mxu1 }
 0x521   : > { %v2768_v1 = vpop.f32.mrb[97].mxu1  ;;  %v2777_v55 = vadd.f32 %v3491_v23, %v3286_v49 }
 0x522   : > { %v3492_v38 = vpop.f32.mrb[98].mxu1  ;;  %v2769_v24 = vadd.f32 %v3286_v49, %v2768_v1 }
 0x523   : > { %2835 = vadd.xlane.f32.xlu1 %v2777_v55  ;;  %v2771_v50 = vpop.f32.mrb[99].mxu1  ;;  %v2780_v2 = vadd.f32 %v3492_v38, %v3286_v49 }
 0x524   : > { %2831 = vadd.xlane.f32.xlu0 %v2769_v24  ;;  %v2772_v25 = vadd.f32 %v3286_v49, %v2771_v50 }
 0x527   : > { %2837 = vadd.xlane.f32.xlu1 %v2780_v2 }
 0x528   : > { %2833 = vadd.xlane.f32.xlu0 %v2772_v25 }
 0x530   : > { %v3495_v56 = vpop.f32.mrb[100].mxu1 }
 0x531   : > { %v2793_v26 = vadd.f32 %v3495_v56, %v3286_v49  ;;  %v2784_v27 = vpop.f32.mrb[101].mxu1 }
 0x532   : > { %v3496_v51 = vpop.f32.mrb[102].mxu1  ;;  %v2785_v29 = vadd.f32 %v3286_v49, %v2784_v27 }
 0x533   : > { %v2796_v57 = vadd.f32 %v3496_v51, %v3286_v49  ;;  %v2787_v28 = vpop.f32.mrb[103].mxu1  ;;  %2843 = vadd.xlane.f32.xlu0 %v2793_v26 }
 0x534   : > { %v2788_v30 = vadd.f32 %v3286_v49, %v2787_v28 }
 0x535   : > { %2845 = vadd.xlane.f32.xlu1 %v2796_v57 }
 0x537   : > { %2839 = vadd.xlane.f32.xlu0 %v2785_v29 }
 0x539   : > { %2841 = vadd.xlane.f32.xlu1 %v2788_v30 }
 0x540   : > { %v3499_v4 = vpop.f32.mrb[104].mxu1 }
 0x541   : > { %v2809_v58 = vadd.f32 %v3499_v4, %v3286_v49  ;;  %v2800_v31 = vpop.f32.mrb[105].mxu1 }
 0x542   : > { %v3500_v3 = vpop.f32.mrb[106].mxu1  ;;  %v2801_v33 = vadd.f32 %v3286_v49, %v2800_v31 }
 0x543   : > { %v2812_v5 = vadd.f32 %v3500_v3, %v3286_v49  ;;  %v2803_v32 = vpop.f32.mrb[107].mxu1  ;;  %2851 = vadd.xlane.f32.xlu0 %v2809_v58 }
 0x544   : > { %v2804_v34 = vadd.f32 %v3286_v49, %v2803_v32 }
 0x545   : > { %2853 = vadd.xlane.f32.xlu1 %v2812_v5 }
 0x547   : > { %2847 = vadd.xlane.f32.xlu0 %v2801_v33 }
 0x549   : > { %2849 = vadd.xlane.f32.xlu1 %v2804_v34 }
 0x550   : > { %v3503_v6 = vpop.f32.mrb[108].mxu1 }
 0x551   : > { %v2816_v35 = vpop.f32.mrb[109].mxu1  ;;  %v2825_v59 = vadd.f32 %v3503_v6, %v3286_v49 }
 0x552   : > { %v2817_v36 = vadd.f32 %v3286_v49, %v2816_v35  ;;  %v3504_v37 = vpop.f32.mrb[110].mxu1 }
 0x553   : > { %v2819_v7 = vpop.f32.mrb[111].mxu1  ;;  %v2828_v40 = vadd.f32 %v3504_v37, %v3286_v49 }
 0x554   : > { %v2820_v39 = vadd.f32 %v3286_v49, %v2819_v7  ;;  %2855 = vadd.xlane.f32.xlu0 %v2817_v36 }
 0x556   : > { %2857 = vadd.xlane.f32.xlu1 %v2820_v39 }
 0x558   : > { %2859 = vadd.xlane.f32.xlu0 %v2825_v59 }
 0x55a   : > { %2861 = vadd.xlane.f32.xlu1 %v2828_v40 }
 0x5b0   : > { %v4738_v41 = vpop.xlane.xlu1 %2835 }
 0x5b1   : > { %v2865_v52 = vand.u32 2147483647, %v4738_v41  ;;  %v4741_v60 = vpop.xlane.xlu0 %2831  ;;  %vm2961_vm2 = vcmp.ge.f32.partialorder %v4738_v41, 0.0 }
 0x5b2   : > { %v2863_v42 = vand.u32 2147483647, %v4741_v60  ;;  %vm2959_vm3 = vcmp.ge.f32.partialorder %v4741_v60, 0.0 }
 0x5b3   : > { %v2881_v14 = vsub.f32 0.0, %v2865_v52 }
 0x5b4   : > { %v2879_v43 = vsub.f32 0.0, %v2863_v42  ;;  %v4744_v8 = vpop.xlane.xlu1 %2837 }
 0x5b5   : > { %v2899_v17 = vmul.f32 1.442695, %v2881_v14  ;;  %v2866_v61 = vand.u32 2147483647, %v4744_v8  ;;  %v4747_v44 = vpop.xlane.xlu0 %2833  ;;  %vm2962_vm4 = vcmp.ge.f32.partialorder %v4744_v8, 0.0 }
 0x5b6   : > { %v2895_v45 = vmul.f32 1.442695, %v2879_v43  ;;  %v2864_v9 = vand.u32 2147483647, %v4747_v44  ;;  %vm2960_vm5 = vcmp.ge.f32.partialorder %v4747_v44, 0.0 }
 0x5b7   : > { %3910 = vpow2.f32 %v2899_v17  ;;  %v2882_v46 = vsub.f32 0.0, %v2866_v61 }
 0x5b8   : > { %3912 = vpow2.f32 %v2895_v45  ;;  %v2880_v18 = vsub.f32 0.0, %v2864_v9 }
 0x5b9   : > { %v2901_v10 = vmul.f32 1.442695, %v2882_v46 }
 0x5ba   : > { %v2897_v11 = vmul.f32 1.442695, %v2880_v18 }
 0x5bb   : > { %3914 = vpow2.f32 %v2901_v10 }
 0x5bc   : > { %3916 = vpow2.f32 %v2897_v11 }
 0x5c0   : > { %v4750_v62 = vpop.xlane.xlu0 %2843 }
 0x5c1   : > { %v3911_v54 = vpop.eup %3910  ;;  %v2869_v47 = vand.u32 2147483647, %v4750_v62  ;;  %vm2965_vm6 = vcmp.ge.f32.partialorder %v4750_v62, 0.0 }
 0x5c2   : > { %v3913_v12 = vpop.eup %3912  ;;  %v2929_v53 = vadd.f32 1.0, %v3911_v54  ;;  %v4753_v13 = vpop.xlane.xlu1 %2845 }
 0x5c3   : > { %v2927_v15 = vadd.f32 1.0, %v3913_v12  ;;  %v2885_v16 = vsub.f32 0.0, %v2869_v47  ;;  %v2870_v19 = vand.u32 2147483647, %v4753_v13  ;;  %vm2966_vm7 = vcmp.ge.f32.partialorder %v4753_v13, 0.0 }
 0x5c4   : > { %3918 = vrcp.f32 %v2929_v53  ;;  %v4756_v63 = vpop.xlane.xlu0 %2839 }
 0x5c5   : > { %v3915_v20 = vpop.eup %3914  ;;  %3920 = vrcp.f32 %v2927_v15  ;;  %v2907_v21 = vmul.f32 1.442695, %v2885_v16  ;;  %v2886_v48 = vsub.f32 0.0, %v2870_v19  ;;  %v2867_v0 = vand.u32 2147483647, %v4756_v63 }
 0x5c6   : > { %v3917_v22 = vpop.eup %3916  ;;  %v2930_v49 = vadd.f32 1.0, %v3915_v20  ;;  %v4759_v23 = vpop.xlane.xlu1 %2841  ;;  %vm2963_vm8 = vcmp.ge.f32.partialorder %v4756_v63, 0.0 }
 0x5c7   : > { %v2928_v1 = vadd.f32 1.0, %v3917_v22  ;;  %3922 = vpow2.f32 %v2907_v21  ;;  %v2909_v55 = vmul.f32 1.442695, %v2886_v48  ;;  %v2883_v38 = vsub.f32 0.0, %v2867_v0 }
 0x5c8   : > { %3924 = vrcp.f32 %v2930_v49  ;;  %v2868_v24 = vand.u32 2147483647, %v4759_v23  ;;  %vm2964_vm9 = vcmp.ge.f32.partialorder %v4759_v23, 0.0 }
 0x5c9   : > { %3926 = vrcp.f32 %v2928_v1  ;;  %v2903_v50 = vmul.f32 1.442695, %v2883_v38 }
 0x5ca   : > { %3928 = vpow2.f32 %v2909_v55  ;;  %v2884_v2 = vsub.f32 0.0, %v2868_v24 }
 0x5cb   : > { %3930 = vpow2.f32 %v2903_v50 }
 0x5cc   : > { %v2905_v25 = vmul.f32 1.442695, %v2884_v2 }
 0x5ce   : > { %v3919_v56 = vpop.eup %3918  ;;  %3932 = vpow2.f32 %v2905_v25 }
 0x5cf   : > { %v3921_v26 = vpop.eup %3920  ;;  %v2977_v27 = vmul.f32 %v3919_v56, %v3911_v54 }
 0x5d0   : > { %v2975_v51 = vmul.f32 %v3921_v26, %v3913_v12  ;;  %v4769_v57 = vpop.xlane.xlu0 %2851 }
 0x5d1   : > { %v3923_v28 = vpop.eup %3922  ;;  %v2993_v29 = vsel %vm2961_vm2, %v3919_v56, %v2977_v27  ;;  %v2873_v30 = vand.u32 2147483647, %v4769_v57  ;;  %vm2969_vm10 = vcmp.ge.f32.partialorder %v4769_v57, 0.0 }
 0x5d2   : > { %v3925_v4 = vpop.eup %3924  ;;  %3010 = vst.msk [vmem:[%s4766_s18 + $0x10] sm:$0xff] %vm3007_vm1, %v2993_v29  ;;  %v2991_v58 = vsel %vm2959_vm3, %v3921_v26, %v2975_v51  ;;  %v2933_v31 = vadd.f32 1.0, %v3923_v28  ;;  %v4775_v3 = vpop.xlane.xlu1 %2853 }
 0x5d3   : > { %v3927_v5 = vpop.eup %3926  ;;  %3008 = vst.msk [vmem:[%s4766_s18] sm:$0xff] %vm3007_vm1, %v2991_v58  ;;  %v2978_v32 = vmul.f32 %v3925_v4, %v3915_v20  ;;  %v2889_v33 = vsub.f32 0.0, %v2873_v30  ;;  %v2874_v34 = vand.u32 2147483647, %v4775_v3  ;;  %vm2970_vm11 = vcmp.ge.f32.partialorder %v4775_v3, 0.0 }
 0x5d4   : > { %v3929_v6 = vpop.eup %3928  ;;  %v2976_v35 = vmul.f32 %v3927_v5, %v3917_v22  ;;  %3934 = vrcp.f32 %v2933_v31  ;;  %v4782_v36 = vpop.xlane.xlu0 %2847 }
 0x5d5   : > { %v3931_v37 = vpop.eup %3930  ;;  %v2994_v7 = vsel %vm2962_vm4, %v3925_v4, %v2978_v32  ;;  %v2934_v39 = vadd.f32 1.0, %v3929_v6  ;;  %v2915_v59 = vmul.f32 1.442695, %v2889_v33  ;;  %v2890_v40 = vsub.f32 0.0, %v2874_v34 }
 0x5d6   : > { %3011 = vst.msk [vmem:[%s4766_s18 + $0x18] sm:$0xff] %vm3007_vm1, %v2994_v7  ;;  %v2992_v41 = vsel %vm2960_vm5, %v3927_v5, %v2976_v35  ;;  %v2931_v52 = vadd.f32 1.0, %v3931_v37  ;;  %v2871_v60 = vand.u32 2147483647, %v4782_v36  ;;  %v4787_v42 = vpop.xlane.xlu1 %2849  ;;  %vm2967_vm12 = vcmp.ge.f32.partialorder %v4782_v36, 0.0 }
 0x5d7   : > { %3009 = vst.msk [vmem:[%s4766_s18 + $0x8] sm:$0xff] %vm3007_vm1, %v2992_v41  ;;  %3936 = vrcp.f32 %v2934_v39  ;;  %v2917_v14 = vmul.f32 1.442695, %v2890_v40  ;;  %v2872_v43 = vand.u32 2147483647, %v4787_v42  ;;  %vm2968_vm13 = vcmp.ge.f32.partialorder %v4787_v42, 0.0 }
 0x5d8   : > { %v3933_v8 = vpop.eup %3932  ;;  %3938 = vrcp.f32 %v2931_v52  ;;  %v2887_v17 = vsub.f32 0.0, %v2871_v60 }
 0x5d9   : > { %v2932_v61 = vadd.f32 1.0, %v3933_v8  ;;  %3940 = vpow2.f32 %v2915_v59  ;;  %v2888_v44 = vsub.f32 0.0, %v2872_v43 }
 0x5da   : > { %3942 = vpow2.f32 %v2917_v14  ;;  %v2911_v45 = vmul.f32 1.442695, %v2887_v17 }
 0x5db   : > { %3944 = vrcp.f32 %v2932_v61  ;;  %v2913_v9 = vmul.f32 1.442695, %v2888_v44 }
 0x5dc   : > { %3946 = vpow2.f32 %v2911_v45 }
 0x5dd   : > { %3948 = vpow2.f32 %v2913_v9 }
 0x5de   : > { %v3935_v46 = vpop.eup %3934 }
 0x5df   : > { %v2981_v18 = vmul.f32 %v3935_v46, %v3923_v28 }
 0x5e1   : > { %v3937_v10 = vpop.eup %3936  ;;  %v2997_v11 = vsel %vm2965_vm6, %v3935_v46, %v2981_v18  ;;  %v4793_v54 = vpop.xlane.xlu0 %2855 }
 0x5e2   : > { %v3939_v47 = vpop.eup %3938  ;;  %3014 = vst.msk [vmem:[%s4766_s18 + $0x30] sm:$0xff] %vm3007_vm1, %v2997_v11  ;;  %v2982_v12 = vmul.f32 %v3937_v10, %v3929_v6  ;;  %v2875_v53 = vand.u32 2147483647, %v4793_v54  ;;  %vm2971_vm14 = vcmp.ge.f32.partialorder %v4793_v54, 0.0 }
 0x5e3   : > { %v3941_v15 = vpop.eup %3940  ;;  %v2979_v16 = vmul.f32 %v3939_v47, %v3931_v37  ;;  %v4800_v19 = vpop.xlane.xlu1 %2857 }
 0x5e4   : > { %v3943_v62 = vpop.eup %3942  ;;  %v2998_v20 = vsel %vm2966_vm7, %v3937_v10, %v2982_v12  ;;  %v2937_v21 = vadd.f32 1.0, %v3941_v15  ;;  %v2891_v48 = vsub.f32 0.0, %v2875_v53  ;;  %v2876_v0 = vand.u32 2147483647, %v4800_v19 }
 0x5e5   : > { %v3945_v22 = vpop.eup %3944  ;;  %3015 = vst.msk [vmem:[%s4766_s18 + $0x38] sm:$0xff] %vm3007_vm1, %v2998_v20  ;;  %v2995_v49 = vsel %vm2963_vm8, %v3939_v47, %v2979_v16  ;;  %v2938_v1 = vadd.f32 1.0, %v3943_v62  ;;  %v4805_v55 = vpop.xlane.xlu0 %2859  ;;  %vm2972_vm15 = vcmp.ge.f32.partialorder %v4800_v19, 0.0 }
 0x5e6   : > { %v3947_v38 = vpop.eup %3946  ;;  %3012 = vst.msk [vmem:[%s4766_s18 + $0x20] sm:$0xff] %vm3007_vm1, %v2995_v49  ;;  %v2980_v13 = vmul.f32 %v3945_v22, %v3933_v8  ;;  %3950 = vrcp.f32 %v2937_v21  ;;  %v2919_v63 = vmul.f32 1.442695, %v2891_v48  ;;  %v2892_v24 = vsub.f32 0.0, %v2876_v0 }
 0x5e7   : > { %v3949_v50 = vpop.eup %3948  ;;  %3952 = vrcp.f32 %v2938_v1  ;;  %v2935_v2 = vadd.f32 1.0, %v3947_v38  ;;  %v2877_v25 = vand.u32 2147483647, %v4805_v55  ;;  %v4811_v56 = vpop.xlane.xlu1 %2861  ;;  %vm2973_vm0 = vcmp.ge.f32.partialorder %v4805_v55, 0.0 }
 0x5e8   : > { %v2996_v26 = vsel %vm2964_vm9, %v3945_v22, %v2980_v13  ;;  %v2936_v27 = vadd.f32 1.0, %v3949_v50  ;;  %3954 = vpow2.f32 %v2919_v63  ;;  %v2921_v51 = vmul.f32 1.442695, %v2892_v24 }
 0x5e9   : > { %3013 = vst.msk [vmem:[%s4766_s18 + $0x28] sm:$0xff] %vm3007_vm1, %v2996_v26  ;;  %3956 = vrcp.f32 %v2935_v2  ;;  %v2893_v28 = vsub.f32 0.0, %v2877_v25  ;;  %v2878_v29 = vand.u32 2147483647, %v4811_v56  ;;  %vm2974_vm2 = vcmp.ge.f32.partialorder %v4811_v56, 0.0 }
 0x5ea   : > { %3958 = vrcp.f32 %v2936_v27 }
 0x5eb   : > { %3960 = vpow2.f32 %v2921_v51  ;;  %v2923_v30 = vmul.f32 1.442695, %v2893_v28  ;;  %v2894_v23 = vsub.f32 0.0, %v2878_v29 }
 0x5ed   : > { %3962 = vpow2.f32 %v2923_v30  ;;  %v2925_v4 = vmul.f32 1.442695, %v2894_v23 }
 0x5ef   : > { %3964 = vpow2.f32 %v2925_v4 }
 0x5f0   : > { %v3951_v58 = vpop.eup %3950 }
 0x5f1   : > { %v3953_v31 = vpop.eup %3952  ;;  %v2985_v5 = vmul.f32 %v3951_v58, %v3941_v15 }
 0x5f2   : > { %v3955_v32 = vpop.eup %3954  ;;  %v2986_v33 = vmul.f32 %v3953_v31, %v3943_v62 }
 0x5f3   : > { %v3957_v34 = vpop.eup %3956  ;;  %v3001_v6 = vsel %vm2969_vm10, %v3951_v58, %v2985_v5  ;;  %v2939_v35 = vadd.f32 1.0, %v3955_v32 }
 0x5f4   : > { %v3959_v37 = vpop.eup %3958  ;;  %3018 = vst.msk [vmem:[%s4766_s18 + $0x50] sm:$0xff] %vm3007_vm1, %v3001_v6  ;;  %v3002_v7 = vsel %vm2970_vm11, %v3953_v31, %v2986_v33  ;;  %v2983_v39 = vmul.f32 %v3957_v34, %v3947_v38 }
 0x5f5   : > { %v3961_v59 = vpop.eup %3960  ;;  %3019 = vst.msk [vmem:[%s4766_s18 + $0x58] sm:$0xff] %vm3007_vm1, %v3002_v7  ;;  %v2984_v40 = vmul.f32 %v3959_v37, %v3949_v50  ;;  %3966 = vrcp.f32 %v2939_v35 }
 0x5f6   : > { %v2999_v57 = vsel %vm2967_vm12, %v3957_v34, %v2983_v39  ;;  %v2940_v41 = vadd.f32 1.0, %v3961_v59 }
 0x5f7   : > { %v3963_v3 = vpop.eup %3962  ;;  %3016 = vst.msk [vmem:[%s4766_s18 + $0x40] sm:$0xff] %vm3007_vm1, %v2999_v57  ;;  %v3000_v52 = vsel %vm2968_vm13, %v3959_v37, %v2984_v40 }
 0x5f8   : > { %3017 = vst.msk [vmem:[%s4766_s18 + $0x48] sm:$0xff] %vm3007_vm1, %v3000_v52  ;;  %3968 = vrcp.f32 %v2940_v41  ;;  %v2941_v60 = vadd.f32 1.0, %v3963_v3 }
 0x5f9   : > { %v3965_v14 = vpop.eup %3964 }
 0x5fa   : > { %3970 = vrcp.f32 %v2941_v60  ;;  %v2942_v43 = vadd.f32 1.0, %v3965_v14 }
 0x5fc   : > { %3972 = vrcp.f32 %v2942_v43 }
 0x5ff   : > { %v3967_v36 = vpop.eup %3966 }
 0x600   : > { %v2987_v8 = vmul.f32 %v3967_v36, %v3955_v32 }
 0x602   : > { %v3969_v42 = vpop.eup %3968  ;;  %v3003_v17 = vsel %vm2971_vm14, %v3967_v36, %v2987_v8 }
 0x603   : > { %3020 = vst.msk [vmem:[%s4766_s18 + $0x60] sm:$0xff] %vm3007_vm1, %v3003_v17  ;;  %v2988_v61 = vmul.f32 %v3969_v42, %v3961_v59 }
 0x604   : > { %v3971_v44 = vpop.eup %3970 }
 0x605   : > { %v3004_v45 = vsel %vm2972_vm15, %v3969_v42, %v2988_v61  ;;  %v2989_v9 = vmul.f32 %v3971_v44, %v3963_v3 }
 0x606   : > { %v3973_v46 = vpop.eup %3972  ;;  %3021 = vst.msk [vmem:[%s4766_s18 + $0x68] sm:$0xff] %vm3007_vm1, %v3004_v45 }
 0x607   : > { %v3005_v18 = vsel %vm2973_vm0, %v3971_v44, %v2989_v9  ;;  %v2990_v10 = vmul.f32 %v3973_v46, %v3965_v14 }
 0x608   : > { %3022 = vst.msk [vmem:[%s4766_s18 + $0x70] sm:$0xff] %vm3007_vm1, %v3005_v18 }
 0x609   : > { %v3006_v11 = vsel %vm2974_vm2, %v3973_v46, %v2990_v10 }
 0x60a   : > { %3023 = vst.msk [vmem:[%s4766_s18 + $0x78] sm:$0xff] %vm3007_vm1, %v3006_v11 }
 0x60b PF: > { %s21_s17 = sadd.s32 1, %s3980_s17  }
 0x60c   : > { %p18_p4 = scmp.ge.s32.totalorder %s21_s17, 4  }
 0x60e   :  { %20 = sbr.rel (!%p18_p4) target bundleno = 1 (0x1), region = 94 }

</bundles_post_ra>
